<compile_context>
chip_gen: v5e
topology: v5e:2x2
jax: 0.10.0
libtpu: 0.0.40
codegen_flags: <defaults>
</compile_context>

<pallas_src>
import functools

import jax
import jax.numpy as jnp
from jax.experimental import pallas as pl
from jax.experimental.pallas import tpu as pltpu

EPS = 1e-5
_VMEM_LIMIT = 32 * 1024 * 1024


# ---------------------------------------------------------------------------
# Fused stem kernel (one program, whole batch resident in VMEM)
# ---------------------------------------------------------------------------
def _stem_kernel(x_ref, t1_ref, t2_ref, t3_ref, p_ref, gb_ref, o_ref, *,
                 width, eps):
    """Conv5x5+BN+ReLU, then 2x (Conv3x3+BN+ReLU), all in one program.

    x_ref  : (N, H, W*Cin)        f32   image in lane-dense column layout
    t*_ref : (Kh*W*Cin_l, W*C)    bf16  Kh-stacked row-Toeplitz weights (fat K)
    p_ref  : (W*C, W*C)           f32   channel fold: P[i,j]=1 iff i%C == j%C
    gb_ref : (6, W*C)             f32   [g1,b1,g2,b2,g3,b3] tiled to columns
    o_ref  : (N, H, W*C)          f32   output (NHWC flattened over (W,C))
    """
    n, h, _ = x_ref.shape
    wc = o_ref.shape[2]
    inv_count = 1.0 / float(n * h * width)       # BN count = N*H*W (per channel)

    p_mat = p_ref[...]                           # (wc, wc) f32
    gb = gb_ref[...]                             # (6, wc)  f32

    def conv(a_cols, t_ref, kh, pad):
        # Row-Toeplitz conv with the Kh taps stacked along K:
        #   one (N*H, kh*W*Ci) @ (kh*W*Ci, W*Co) bf16 MXU matmul, f32 accum.
        wci = a_cols.shape[2]
        zrow = jnp.zeros((n, pad, wci), jnp.float32)
        apad = jnp.concatenate([zrow, a_cols, zrow], axis=1)          # H halo
        op = jnp.concatenate([apad[:, k:k + h, :] for k in range(kh)], axis=2)
        op = op.reshape(n * h, kh * wci).astype(jnp.bfloat16)
        return jnp.dot(op, t_ref[...], preferred_element_type=jnp.float32)

    def bn_relu(y, g_row, b_row):
        # Training-mode BatchNorm2d (biased batch var), two-pass stats in f32.
        # Per-channel reduction over W via one (1,wc)@(wc,wc) projection matmul
        # (keeps everything lane-dense, no (W,C) reshapes in the kernel).
        mean_cols = jnp.dot(jnp.sum(y, axis=0, keepdims=True), p_mat,
                            preferred_element_type=jnp.float32) * inv_count
        cen = y - mean_cols
        var_cols = jnp.dot(jnp.sum(cen * cen, axis=0, keepdims=True), p_mat,
                           preferred_element_type=jnp.float32) * inv_count
        scale = g_row * jax.lax.rsqrt(var_cols + eps)
        return jnp.maximum(cen * scale + b_row, 0.0)

    a1 = bn_relu(conv(x_ref[...], t1_ref, 5, 2), gb[0:1], gb[1:2])
    a2 = bn_relu(conv(a1.reshape(n, h, wc), t2_ref, 3, 1), gb[2:3], gb[3:4])
    a3 = bn_relu(conv(a2.reshape(n, h, wc), t3_ref, 3, 1), gb[4:5], gb[5:6])
    o_ref[...] = a3.reshape(n, h, wc)


# ---------------------------------------------------------------------------
# Wrapper-side helpers
# ---------------------------------------------------------------------------
def _build_stacked_toeplitz(w_hwio, width, pad, dtype=jnp.bfloat16):
    """(Kh, Kw, Cin, Cout) -> (Kh*width*Cin, width*Cout), fully vectorized.

    T[kh*W*Cin + wi*Cin + ci, wo*Cout + co] = w[kh, wi-wo+pad, ci, co]
    when 0 <= wi-wo+pad < Kw, else 0  (W zero-padding folded into the band).
    """
    kh, kw, cin, cout = w_hwio.shape
    wi = jnp.arange(width)[:, None]
    wo = jnp.arange(width)[None, :]
    dk = wi - wo + pad                                  # (W, W)
    valid = (dk >= 0) & (dk < kw)
    dk_c = jnp.clip(dk, 0, kw - 1)
    t = w_hwio[:, dk_c]                                 # (Kh, W, W, Cin, Cout)
    t = jnp.where(valid[None, :, :, None, None], t, 0.0)
    t = jnp.transpose(t, (0, 1, 3, 2, 4))               # (Kh, wi, Cin, wo, Cout)
    return t.reshape(kh * width * cin, width * cout).astype(dtype)


def basic_convolutional_stem(x_nchw, params, channels_last=False):
    """x_nchw: (N, Cin, H, W) float32 -> (N, Cout, H, W) (or NHWC)."""
    n, cin, h, w = x_nchw.shape
    c = params['w1'].shape[-1]
    wc = w * c

    # NCHW -> lane-dense (N, H, W*Cin) column layout (channel minor per column)
    x_cols = jnp.transpose(x_nchw, (0, 2, 3, 1)).reshape(n, h, w * cin)
    x_cols = x_cols.astype(jnp.float32)

    t1 = _build_stacked_toeplitz(params['w1'], w, 2)    # (5*W*Cin, W*C) bf16
    t2 = _build_stacked_toeplitz(params['w2'], w, 1)    # (3*W*C,   W*C) bf16
    t3 = _build_stacked_toeplitz(params['w3'], w, 1)

    idx = jnp.arange(wc)
    p_mat = (idx[:, None] % c == idx[None, :] % c).astype(jnp.float32)

    gb = jnp.stack([jnp.tile(params[k], w)
                    for k in ('g1', 'b1', 'g2', 'b2', 'g3', 'b3')])   # (6, wc)

    kernel = functools.partial(_stem_kernel, width=w, eps=EPS)
    out_cols = pl.pallas_call(
        kernel,
        grid=(1,),
        in_specs=[
            pl.BlockSpec((n, h, w * cin), lambda i: (0, 0, 0)),
            pl.BlockSpec(t1.shape, lambda i: (0, 0)),
            pl.BlockSpec(t2.shape, lambda i: (0, 0)),
            pl.BlockSpec(t3.shape, lambda i: (0, 0)),
            pl.BlockSpec((wc, wc), lambda i: (0, 0)),
            pl.BlockSpec((6, wc), lambda i: (0, 0)),
        ],
        out_specs=pl.BlockSpec((n, h, wc), lambda i: (0, 0, 0)),
        out_shape=jax.ShapeDtypeStruct((n, h, wc), jnp.float32),
        compiler_params=pltpu.CompilerParams(
            dimension_semantics=("arbitrary",),
            vmem_limit_bytes=_VMEM_LIMIT),
    )(x_cols, t1, t2, t3, p_mat, gb)

    out_nhwc = out_cols.reshape(n, h, w, c)
    if channels_last:
        return out_nhwc                                # no NCHW transpose pass
    return jnp.transpose(out_nhwc, (0, 3, 1, 2))       # PyTorch NCHW parity


# ---------------------------------------------------------------------------
# Pure-JAX f32 reference (matches PyTorch module semantics)
# ---------------------------------------------------------------------------
def _reference(x_nchw, params):
    def conv(x, w, pad):
        return jax.lax.conv_general_dilated(
            x, w, window_strides=(1, 1), padding=[(pad, pad), (pad, pad)],
            dimension_numbers=('NHWC', 'HWIO', 'NHWC'))

    def bn_relu(y, g, b):
        mean = jnp.mean(y, axis=(0, 1, 2), keepdims=True)
        var = jnp.mean(jnp.square(y - mean), axis=(0, 1, 2), keepdims=True)
        yn = (y - mean) / jnp.sqrt(var + EPS)
        return jnp.maximum(yn * g.reshape(1, 1, 1, -1) + b.reshape(1, 1, 1, -1),
                           0.0)

    x = jnp.transpose(x_nchw, (0, 2, 3, 1))
    y = bn_relu(conv(x, params['w1'], 2), params['g1'], params['b1'])
    y = bn_relu(conv(y, params['w2'], 1), params['g2'], params['b2'])
    y = bn_relu(conv(y, params['w3'], 1), params['g3'], params['b3'])
    return jnp.transpose(y, (0, 3, 1, 2))


def _init_params(key, in_channels=1, out_channels=8):
    ks = jax.random.split(key, 9)

    def w_init(k, shape):
        fan_in = shape[0] * shape[1] * shape[2]
        return jax.random.normal(k, shape, jnp.float32) * jnp.sqrt(2.0 / fan_in)

    c = out_channels
    return {
        'w1': w_init(ks[0], (5, 5, in_channels, c)),   # HWIO
        'w2': w_init(ks[1], (3, 3, c, c)),
        'w3': w_init(ks[2], (3, 3, c, c)),
        'g1': 1.0 + 0.1 * jax.random.normal(ks[3], (c,), jnp.float32),
        'b1': 0.1 * jax.random.normal(ks[4], (c,), jnp.float32),
        'g2': 1.0 + 0.1 * jax.random.normal(ks[5], (c,), jnp.float32),
        'b2': 0.1 * jax.random.normal(ks[6], (c,), jnp.float32),
        'g3': 1.0 + 0.1 * jax.random.normal(ks[7], (c,), jnp.float32),
        'b3': 0.1 * jax.random.normal(ks[8], (c,), jnp.float32),
    }


if __name__ == "__main__":
    key = jax.random.PRNGKey(0)
    k_x, k_p = jax.random.split(key)

    N, Cin, H, W = 2, 1, 16, 16          # module default: in_channels=1
    Cout = 8                             # module default: out_channels=8
    x = jax.random.normal(k_x, (N, Cin, H, W), jnp.float32)
    params = _init_params(k_p, Cin, Cout)

    fwd = jax.jit(basic_convolutional_stem)
    y = jax.block_until_ready(fwd(x, params))

    y_ref = jax.block_until_ready(jax.jit(_reference)(x, params))
    assert y.shape == (N, Cout, H, W), y.shape
    # Tolerance reflects bf16 MXU operands in the conv matmuls (stats/BN in f32);
    # observed error is ~1e-2 worst-case on O(1) normalized activations.
    assert jnp.allclose(y, y_ref, atol=3e-2, rtol=3e-2), \
        float(jnp.max(jnp.abs(y - y_ref)))

    print("KERNEL_OK")
</pallas_src>

<mosaic_0001>
module attributes {stable_mosaic.version = 11 : i64} {
  func.func @_stem_kernel(%arg0: i32, %arg1: memref<2x16x16xf32, #tpu.memory_space<vmem>>, %arg2: memref<80x128xbf16, #tpu.memory_space<vmem>>, %arg3: memref<384x128xbf16, #tpu.memory_space<vmem>>, %arg4: memref<384x128xbf16, #tpu.memory_space<vmem>>, %arg5: memref<128x128xf32, #tpu.memory_space<vmem>>, %arg6: memref<6x128xf32, #tpu.memory_space<vmem>>, %arg7: memref<2x16x128xf32, #tpu.memory_space<vmem>>) attributes {dimension_semantics = [#tpu.dimension_semantics<arbitrary>], iteration_bounds = array<i64: 1>, scalar_prefetch = 0 : i64, scratch_operands = 0 : i64, tpu.core_type = #tpu.core_type<tc>, window_params = [{pipeline_mode = #tpu.pipeline_mode<synchronous>, transform_indices = @transform_0, window_bounds = array<i64: 2, 16, 16>}, {pipeline_mode = #tpu.pipeline_mode<synchronous>, transform_indices = @transform_1, window_bounds = array<i64: 80, 128>}, {pipeline_mode = #tpu.pipeline_mode<synchronous>, transform_indices = @transform_2, window_bounds = array<i64: 384, 128>}, {pipeline_mode = #tpu.pipeline_mode<synchronous>, transform_indices = @transform_3, window_bounds = array<i64: 384, 128>}, {pipeline_mode = #tpu.pipeline_mode<synchronous>, transform_indices = @transform_4, window_bounds = array<i64: 128, 128>}, {pipeline_mode = #tpu.pipeline_mode<synchronous>, transform_indices = @transform_5, window_bounds = array<i64: 6, 128>}, {pipeline_mode = #tpu.pipeline_mode<synchronous>, transform_indices = @transform_6, window_bounds = array<i64: 2, 16, 128>}]} {
    %c0 = arith.constant 0 : index
    %c0_0 = arith.constant 0 : index
    %0 = vector.load %arg5[%c0, %c0_0] : memref<128x128xf32, #tpu.memory_space<vmem>>, vector<128x128xf32>
    %c0_1 = arith.constant 0 : index
    %c0_2 = arith.constant 0 : index
    %1 = vector.load %arg6[%c0_1, %c0_2] : memref<6x128xf32, #tpu.memory_space<vmem>>, vector<6x128xf32>
    %c0_3 = arith.constant 0 : index
    %c0_4 = arith.constant 0 : index
    %c0_5 = arith.constant 0 : index
    %2 = vector.load %arg1[%c0_3, %c0_4, %c0_5] : memref<2x16x16xf32, #tpu.memory_space<vmem>>, vector<2x16x16xf32>
    %cst = arith.constant 0.000000e+00 : f32
    %3 = vector.broadcast %cst : f32 to vector<2x2x16xf32>
    %4 = tpu.concatenate %3, %2, %3 in 1 : vector<2x2x16xf32>, vector<2x16x16xf32>, vector<2x2x16xf32> -> vector<2x20x16xf32>
    %5 = vector.extract_strided_slice %4 {offsets = [0, 0, 0], sizes = [2, 16, 16], strides = [1, 1, 1]} : vector<2x20x16xf32> to vector<2x16x16xf32>
    %6 = vector.extract_strided_slice %4 {offsets = [0, 1, 0], sizes = [2, 16, 16], strides = [1, 1, 1]} : vector<2x20x16xf32> to vector<2x16x16xf32>
    %7 = vector.extract_strided_slice %4 {offsets = [0, 2, 0], sizes = [2, 16, 16], strides = [1, 1, 1]} : vector<2x20x16xf32> to vector<2x16x16xf32>
    %8 = vector.extract_strided_slice %4 {offsets = [0, 3, 0], sizes = [2, 16, 16], strides = [1, 1, 1]} : vector<2x20x16xf32> to vector<2x16x16xf32>
    %9 = vector.extract_strided_slice %4 {offsets = [0, 4, 0], sizes = [2, 16, 16], strides = [1, 1, 1]} : vector<2x20x16xf32> to vector<2x16x16xf32>
    %10 = tpu.concatenate %5, %6, %7, %8, %9 in 2 : vector<2x16x16xf32>, vector<2x16x16xf32>, vector<2x16x16xf32>, vector<2x16x16xf32>, vector<2x16x16xf32> -> vector<2x16x80xf32>
    %11 = vector.shape_cast %10 : vector<2x16x80xf32> to vector<32x80xf32>
    %12 = arith.truncf %11 : vector<32x80xf32> to vector<32x80xbf16>
    %c0_6 = arith.constant 0 : index
    %c0_7 = arith.constant 0 : index
    %13 = vector.load %arg2[%c0_6, %c0_7] : memref<80x128xbf16, #tpu.memory_space<vmem>>, vector<80x128xbf16>
    %cst_8 = arith.constant dense<0.000000e+00> : vector<32x128xf32>
    %14 = tpu.matmul %12, %13, %cst_8 {dimension_numbers = #tpu.dot_dimension_numbers<[1], [0], [0], [1], [0, 0, 1, 1], [], []>} : vector<32x80xbf16>, vector<80x128xbf16>, vector<32x128xf32> -> vector<32x128xf32>
    %15 = vector.extract_strided_slice %1 {offsets = [0, 0], sizes = [1, 128], strides = [1, 1]} : vector<6x128xf32> to vector<1x128xf32>
    %16 = vector.extract_strided_slice %1 {offsets = [1, 0], sizes = [1, 128], strides = [1, 1]} : vector<6x128xf32> to vector<1x128xf32>
    %cst_9 = arith.constant dense<0.000000e+00> : vector<128xf32>
    %17 = vector.multi_reduction <add>, %14, %cst_9 [0] : vector<32x128xf32> to vector<128xf32>
    %18 = vector.shape_cast %17 : vector<128xf32> to vector<1x128xf32>
    %cst_10 = arith.constant dense<0.000000e+00> : vector<1x128xf32>
    %19 = tpu.matmul %18, %0, %cst_10 {dimension_numbers = #tpu.dot_dimension_numbers<[1], [0], [0], [1], [0, 0, 1, 1], [], []>} : vector<1x128xf32>, vector<128x128xf32>, vector<1x128xf32> -> vector<1x128xf32>
    %cst_11 = arith.constant 0.001953125 : f32
    %20 = vector.broadcast %cst_11 : f32 to vector<1x128xf32>
    %21 = arith.mulf %19, %20 : vector<1x128xf32>
    %22 = vector.broadcast %21 : vector<1x128xf32> to vector<32x128xf32>
    %23 = arith.subf %14, %22 : vector<32x128xf32>
    %24 = arith.mulf %23, %23 : vector<32x128xf32>
    %cst_12 = arith.constant dense<0.000000e+00> : vector<128xf32>
    %25 = vector.multi_reduction <add>, %24, %cst_12 [0] : vector<32x128xf32> to vector<128xf32>
    %26 = vector.shape_cast %25 : vector<128xf32> to vector<1x128xf32>
    %cst_13 = arith.constant dense<0.000000e+00> : vector<1x128xf32>
    %27 = tpu.matmul %26, %0, %cst_13 {dimension_numbers = #tpu.dot_dimension_numbers<[1], [0], [0], [1], [0, 0, 1, 1], [], []>} : vector<1x128xf32>, vector<128x128xf32>, vector<1x128xf32> -> vector<1x128xf32>
    %cst_14 = arith.constant 0.001953125 : f32
    %28 = vector.broadcast %cst_14 : f32 to vector<1x128xf32>
    %29 = arith.mulf %27, %28 : vector<1x128xf32>
    %cst_15 = arith.constant 9.99999974E-6 : f32
    %30 = vector.broadcast %cst_15 : f32 to vector<1x128xf32>
    %31 = arith.addf %29, %30 : vector<1x128xf32>
    %32 = math.rsqrt %31 : vector<1x128xf32>
    %33 = arith.mulf %15, %32 : vector<1x128xf32>
    %34 = vector.broadcast %33 : vector<1x128xf32> to vector<32x128xf32>
    %35 = arith.mulf %23, %34 : vector<32x128xf32>
    %36 = vector.broadcast %16 : vector<1x128xf32> to vector<32x128xf32>
    %37 = arith.addf %35, %36 : vector<32x128xf32>
    %cst_16 = arith.constant 0.000000e+00 : f32
    %38 = vector.broadcast %cst_16 : f32 to vector<32x128xf32>
    %39 = arith.maximumf %37, %38 : vector<32x128xf32>
    %40 = vector.shape_cast %39 : vector<32x128xf32> to vector<2x16x128xf32>
    %cst_17 = arith.constant 0.000000e+00 : f32
    %41 = vector.broadcast %cst_17 : f32 to vector<2x1x128xf32>
    %42 = tpu.concatenate %41, %40, %41 in 1 : vector<2x1x128xf32>, vector<2x16x128xf32>, vector<2x1x128xf32> -> vector<2x18x128xf32>
    %43 = vector.extract_strided_slice %42 {offsets = [0, 0, 0], sizes = [2, 16, 128], strides = [1, 1, 1]} : vector<2x18x128xf32> to vector<2x16x128xf32>
    %44 = vector.extract_strided_slice %42 {offsets = [0, 1, 0], sizes = [2, 16, 128], strides = [1, 1, 1]} : vector<2x18x128xf32> to vector<2x16x128xf32>
    %45 = vector.extract_strided_slice %42 {offsets = [0, 2, 0], sizes = [2, 16, 128], strides = [1, 1, 1]} : vector<2x18x128xf32> to vector<2x16x128xf32>
    %46 = tpu.concatenate %43, %44, %45 in 2 : vector<2x16x128xf32>, vector<2x16x128xf32>, vector<2x16x128xf32> -> vector<2x16x384xf32>
    %47 = vector.shape_cast %46 : vector<2x16x384xf32> to vector<32x384xf32>
    %48 = arith.truncf %47 : vector<32x384xf32> to vector<32x384xbf16>
    %c0_18 = arith.constant 0 : index
    %c0_19 = arith.constant 0 : index
    %49 = vector.load %arg3[%c0_18, %c0_19] : memref<384x128xbf16, #tpu.memory_space<vmem>>, vector<384x128xbf16>
    %cst_20 = arith.constant dense<0.000000e+00> : vector<32x128xf32>
    %50 = tpu.matmul %48, %49, %cst_20 {dimension_numbers = #tpu.dot_dimension_numbers<[1], [0], [0], [1], [0, 0, 1, 1], [], []>} : vector<32x384xbf16>, vector<384x128xbf16>, vector<32x128xf32> -> vector<32x128xf32>
    %51 = vector.extract_strided_slice %1 {offsets = [2, 0], sizes = [1, 128], strides = [1, 1]} : vector<6x128xf32> to vector<1x128xf32>
    %52 = vector.extract_strided_slice %1 {offsets = [3, 0], sizes = [1, 128], strides = [1, 1]} : vector<6x128xf32> to vector<1x128xf32>
    %cst_21 = arith.constant dense<0.000000e+00> : vector<128xf32>
    %53 = vector.multi_reduction <add>, %50, %cst_21 [0] : vector<32x128xf32> to vector<128xf32>
    %54 = vector.shape_cast %53 : vector<128xf32> to vector<1x128xf32>
    %cst_22 = arith.constant dense<0.000000e+00> : vector<1x128xf32>
    %55 = tpu.matmul %54, %0, %cst_22 {dimension_numbers = #tpu.dot_dimension_numbers<[1], [0], [0], [1], [0, 0, 1, 1], [], []>} : vector<1x128xf32>, vector<128x128xf32>, vector<1x128xf32> -> vector<1x128xf32>
    %cst_23 = arith.constant 0.001953125 : f32
    %56 = vector.broadcast %cst_23 : f32 to vector<1x128xf32>
    %57 = arith.mulf %55, %56 : vector<1x128xf32>
    %58 = vector.broadcast %57 : vector<1x128xf32> to vector<32x128xf32>
    %59 = arith.subf %50, %58 : vector<32x128xf32>
    %60 = arith.mulf %59, %59 : vector<32x128xf32>
    %cst_24 = arith.constant dense<0.000000e+00> : vector<128xf32>
    %61 = vector.multi_reduction <add>, %60, %cst_24 [0] : vector<32x128xf32> to vector<128xf32>
    %62 = vector.shape_cast %61 : vector<128xf32> to vector<1x128xf32>
    %cst_25 = arith.constant dense<0.000000e+00> : vector<1x128xf32>
    %63 = tpu.matmul %62, %0, %cst_25 {dimension_numbers = #tpu.dot_dimension_numbers<[1], [0], [0], [1], [0, 0, 1, 1], [], []>} : vector<1x128xf32>, vector<128x128xf32>, vector<1x128xf32> -> vector<1x128xf32>
    %cst_26 = arith.constant 0.001953125 : f32
    %64 = vector.broadcast %cst_26 : f32 to vector<1x128xf32>
    %65 = arith.mulf %63, %64 : vector<1x128xf32>
    %cst_27 = arith.constant 9.99999974E-6 : f32
    %66 = vector.broadcast %cst_27 : f32 to vector<1x128xf32>
    %67 = arith.addf %65, %66 : vector<1x128xf32>
    %68 = math.rsqrt %67 : vector<1x128xf32>
    %69 = arith.mulf %51, %68 : vector<1x128xf32>
    %70 = vector.broadcast %69 : vector<1x128xf32> to vector<32x128xf32>
    %71 = arith.mulf %59, %70 : vector<32x128xf32>
    %72 = vector.broadcast %52 : vector<1x128xf32> to vector<32x128xf32>
    %73 = arith.addf %71, %72 : vector<32x128xf32>
    %cst_28 = arith.constant 0.000000e+00 : f32
    %74 = vector.broadcast %cst_28 : f32 to vector<32x128xf32>
    %75 = arith.maximumf %73, %74 : vector<32x128xf32>
    %76 = vector.shape_cast %75 : vector<32x128xf32> to vector<2x16x128xf32>
    %cst_29 = arith.constant 0.000000e+00 : f32
    %77 = vector.broadcast %cst_29 : f32 to vector<2x1x128xf32>
    %78 = tpu.concatenate %77, %76, %77 in 1 : vector<2x1x128xf32>, vector<2x16x128xf32>, vector<2x1x128xf32> -> vector<2x18x128xf32>
    %79 = vector.extract_strided_slice %78 {offsets = [0, 0, 0], sizes = [2, 16, 128], strides = [1, 1, 1]} : vector<2x18x128xf32> to vector<2x16x128xf32>
    %80 = vector.extract_strided_slice %78 {offsets = [0, 1, 0], sizes = [2, 16, 128], strides = [1, 1, 1]} : vector<2x18x128xf32> to vector<2x16x128xf32>
    %81 = vector.extract_strided_slice %78 {offsets = [0, 2, 0], sizes = [2, 16, 128], strides = [1, 1, 1]} : vector<2x18x128xf32> to vector<2x16x128xf32>
    %82 = tpu.concatenate %79, %80, %81 in 2 : vector<2x16x128xf32>, vector<2x16x128xf32>, vector<2x16x128xf32> -> vector<2x16x384xf32>
    %83 = vector.shape_cast %82 : vector<2x16x384xf32> to vector<32x384xf32>
    %84 = arith.truncf %83 : vector<32x384xf32> to vector<32x384xbf16>
    %c0_30 = arith.constant 0 : index
    %c0_31 = arith.constant 0 : index
    %85 = vector.load %arg4[%c0_30, %c0_31] : memref<384x128xbf16, #tpu.memory_space<vmem>>, vector<384x128xbf16>
    %cst_32 = arith.constant dense<0.000000e+00> : vector<32x128xf32>
    %86 = tpu.matmul %84, %85, %cst_32 {dimension_numbers = #tpu.dot_dimension_numbers<[1], [0], [0], [1], [0, 0, 1, 1], [], []>} : vector<32x384xbf16>, vector<384x128xbf16>, vector<32x128xf32> -> vector<32x128xf32>
    %87 = vector.extract_strided_slice %1 {offsets = [4, 0], sizes = [1, 128], strides = [1, 1]} : vector<6x128xf32> to vector<1x128xf32>
    %88 = vector.extract_strided_slice %1 {offsets = [5, 0], sizes = [1, 128], strides = [1, 1]} : vector<6x128xf32> to vector<1x128xf32>
    %cst_33 = arith.constant dense<0.000000e+00> : vector<128xf32>
    %89 = vector.multi_reduction <add>, %86, %cst_33 [0] : vector<32x128xf32> to vector<128xf32>
    %90 = vector.shape_cast %89 : vector<128xf32> to vector<1x128xf32>
    %cst_34 = arith.constant dense<0.000000e+00> : vector<1x128xf32>
    %91 = tpu.matmul %90, %0, %cst_34 {dimension_numbers = #tpu.dot_dimension_numbers<[1], [0], [0], [1], [0, 0, 1, 1], [], []>} : vector<1x128xf32>, vector<128x128xf32>, vector<1x128xf32> -> vector<1x128xf32>
    %cst_35 = arith.constant 0.001953125 : f32
    %92 = vector.broadcast %cst_35 : f32 to vector<1x128xf32>
    %93 = arith.mulf %91, %92 : vector<1x128xf32>
    %94 = vector.broadcast %93 : vector<1x128xf32> to vector<32x128xf32>
    %95 = arith.subf %86, %94 : vector<32x128xf32>
    %96 = arith.mulf %95, %95 : vector<32x128xf32>
    %cst_36 = arith.constant dense<0.000000e+00> : vector<128xf32>
    %97 = vector.multi_reduction <add>, %96, %cst_36 [0] : vector<32x128xf32> to vector<128xf32>
    %98 = vector.shape_cast %97 : vector<128xf32> to vector<1x128xf32>
    %cst_37 = arith.constant dense<0.000000e+00> : vector<1x128xf32>
    %99 = tpu.matmul %98, %0, %cst_37 {dimension_numbers = #tpu.dot_dimension_numbers<[1], [0], [0], [1], [0, 0, 1, 1], [], []>} : vector<1x128xf32>, vector<128x128xf32>, vector<1x128xf32> -> vector<1x128xf32>
    %cst_38 = arith.constant 0.001953125 : f32
    %100 = vector.broadcast %cst_38 : f32 to vector<1x128xf32>
    %101 = arith.mulf %99, %100 : vector<1x128xf32>
    %cst_39 = arith.constant 9.99999974E-6 : f32
    %102 = vector.broadcast %cst_39 : f32 to vector<1x128xf32>
    %103 = arith.addf %101, %102 : vector<1x128xf32>
    %104 = math.rsqrt %103 : vector<1x128xf32>
    %105 = arith.mulf %87, %104 : vector<1x128xf32>
    %106 = vector.broadcast %105 : vector<1x128xf32> to vector<32x128xf32>
    %107 = arith.mulf %95, %106 : vector<32x128xf32>
    %108 = vector.broadcast %88 : vector<1x128xf32> to vector<32x128xf32>
    %109 = arith.addf %107, %108 : vector<32x128xf32>
    %cst_40 = arith.constant 0.000000e+00 : f32
    %110 = vector.broadcast %cst_40 : f32 to vector<32x128xf32>
    %111 = arith.maximumf %109, %110 : vector<32x128xf32>
    %112 = vector.shape_cast %111 : vector<32x128xf32> to vector<2x16x128xf32>
    %c0_41 = arith.constant 0 : index
    %c0_42 = arith.constant 0 : index
    %c0_43 = arith.constant 0 : index
    %113 = vector.load %arg7[%c0_41, %c0_42, %c0_43] : memref<2x16x128xf32, #tpu.memory_space<vmem>>, vector<2x16x128xf32>
    tpu.vector_store %arg7[%c0_41, %c0_42, %c0_43], %112 {strides = array<i32>} : memref<2x16x128xf32, #tpu.memory_space<vmem>>, vector<2x16x128xf32>,
    return
  }
  func.func @transform_0(%arg0: i32) -> (i32, i32, i32) {
    %c0_i32 = arith.constant 0 : i32
    %c0_i32_0 = arith.constant 0 : i32
    %c0_i32_1 = arith.constant 0 : i32
    %c0_i32_2 = arith.constant 0 : i32
    return %c0_i32, %c0_i32_0, %c0_i32_1 : i32, i32, i32
  }
  func.func @transform_1(%arg0: i32) -> (i32, i32) {
    %c0_i32 = arith.constant 0 : i32
    %c0_i32_0 = arith.constant 0 : i32
    %c0_i32_1 = arith.constant 0 : i32
    return %c0_i32, %c0_i32_0 : i32, i32
  }
  func.func @transform_2(%arg0: i32) -> (i32, i32) {
    %c0_i32 = arith.constant 0 : i32
    %c0_i32_0 = arith.constant 0 : i32
    %c0_i32_1 = arith.constant 0 : i32
    return %c0_i32, %c0_i32_0 : i32, i32
  }
  func.func @transform_3(%arg0: i32) -> (i32, i32) {
    %c0_i32 = arith.constant 0 : i32
    %c0_i32_0 = arith.constant 0 : i32
    %c0_i32_1 = arith.constant 0 : i32
    return %c0_i32, %c0_i32_0 : i32, i32
  }
  func.func @transform_4(%arg0: i32) -> (i32, i32) {
    %c0_i32 = arith.constant 0 : i32
    %c0_i32_0 = arith.constant 0 : i32
    %c0_i32_1 = arith.constant 0 : i32
    return %c0_i32, %c0_i32_0 : i32, i32
  }
  func.func @transform_5(%arg0: i32) -> (i32, i32) {
    %c0_i32 = arith.constant 0 : i32
    %c0_i32_0 = arith.constant 0 : i32
    %c0_i32_1 = arith.constant 0 : i32
    return %c0_i32, %c0_i32_0 : i32, i32
  }
  func.func @transform_6(%arg0: i32) -> (i32, i32, i32) {
    %c0_i32 = arith.constant 0 : i32
    %c0_i32_0 = arith.constant 0 : i32
    %c0_i32_1 = arith.constant 0 : i32
    %c0_i32_2 = arith.constant 0 : i32
    return %c0_i32, %c0_i32_0, %c0_i32_1 : i32, i32, i32
  }
}

</mosaic_0001>

<bundles_post_ra>
// kernel: tile.33
= control target key start
LH: loop header
LB: loop body
LE: loop exit
PB: predicated region body
PF: predicated region fallthrough
CT: control target
= control target key end

     0   :  { %s28_s0 = inlined_call_operand.vmem [shape: f32[8], index: 0, kind: input, shape index: {}]   ;;  %s29_s1 = inlined_call_operand.vmem [shape: f32[16,8], index: 1, kind: output, shape index: {}]  }
   0x1   :  { %v4_v0 = vld [vmem:[%s28_s0] ss:$0 sm:$0xff] }
   0x2   :  { %5 = vst [vmem:[%s29_s1] sm:$0xff] %v4_v0 }
   0x3   :  { %8 = vst [vmem:[%s29_s1 + $0x8] sm:$0xff] %v4_v0 }

// kernel: tile.54
= control target key start
LH: loop header
LB: loop body
LE: loop exit
PB: predicated region body
PF: predicated region fallthrough
CT: control target
= control target key end

     0   :  { %s131_s10 = smov 120   ;;  %s132_s11 = smov 104   ;;  %vm3_vm0 = vcmask 64512   ;;  %vm9_vm1 = vcmask 1048512   ;;  %vm15_vm2 = vcmask 982912   ;;  %vm21_vm3 = vcmask 917312   ;;  %s207_s0 = inlined_call_operand.vmem [shape: f32[16,8], index: 0, kind: input, shape index: {}]   ;;  %s208_s1 = inlined_call_operand.vmem [shape: f32[1,128], index: 1, kind: output, shape index: {}]  }
   0x1   :  { %v101_v0 = vld [vmem:[%s207_s0 + $0xf] sm:$0x1]   ;;  %v103_v1 = vld [vmem:[%s207_s0 + $0xd] sm:$0x1]   ;;  %v105_v2 = vld [vmem:[%s207_s0 + $0xb] sm:$0x1]  }
   0x2   :  { %7 = vrot.lane.b32.xlu0 %v101_v0, %s131_s10  ;;  %19 = vrot.lane.b32.xlu1 %v103_v1, %s132_s11  ;;  %s133_s14 = smov 88   ;;  %v102_v3 = vld [vmem:[%s207_s0 + $0xe] sm:$0x1]   ;;  %v104_v4 = vld [vmem:[%s207_s0 + $0xc] sm:$0x1]   ;;  %s134_s19 = smov 112  }
   0x3   :  { %31 = vrot.lane.b32.xlu2 %v105_v2, %s133_s14  ;;  %s135_s20 = smov 96   ;;  %v106_v5 = vld [vmem:[%s207_s0 + $0xa] sm:$0x1]   ;;  %s136_s23 = smov 80   ;;  %v107_v6 = vld [vmem:[%s207_s0 + $0x9] sm:$0x1]  }
   0x4   :  { %v108_v7 = vld [vmem:[%s207_s0 + $0x8] sm:$0x1]   ;;  %s137_s28 = smov 72   ;;  %s138_s29 = smov 64   ;;  %v109_v8 = vld [vmem:[%s207_s0 + $0x7] sm:$0x1]  }
   0x5   :  { %s139_s3 = smov 56   ;;  %v110_v9 = vld [vmem:[%s207_s0 + $0x6] sm:$0x1]   ;;  %v111_v10 = vld [vmem:[%s207_s0 + $0x5] sm:$0x1]   ;;  %s140_s8 = smov 48  }
   0x6   :  { %s141_s9 = smov 40   ;;  %v112_v11 = vld [vmem:[%s207_s0 + $0x4] sm:$0x1]   ;;  %s142_s12 = smov 32   ;;  %v113_v12 = vld [vmem:[%s207_s0 + $0x3] sm:$0x1]  }
   0x7   :  { %v114_v13 = vld [vmem:[%s207_s0 + $0x2] sm:$0x1]   ;;  %s143_s17 = smov 24   ;;  %s144_s18 = smov 16   ;;  %v115_v14 = vld [vmem:[%s207_s0 + $0x1] sm:$0x1]  }
   0x8   :  { %s145_s21 = smov 8   ;;  %v2_v15 = vld [vmem:[%s207_s0] sm:$0x1]   ;;  %vm27_vm4 = vcmask 851712   ;;  %vm33_vm5 = vcmask 786112   ;;  %vm39_vm6 = vcmask 720512  }
   0x9   :  { %4 = vst.msk [vmem:[#allocation0] sm:$0x1] %vm3_vm0, %v2_v15   ;;  %vm45_vm7 = vcmask 654912   ;;  %vm51_vm8 = vcmask 589312   ;;  %vm57_vm9 = vcmask 523712   ;;  %vm63_vm10 = vcmask 458112  }
   0xa   :  { %13 = vrot.lane.b32.xlu0 %v102_v3, %s134_s19  ;;  %25 = vrot.lane.b32.xlu1 %v104_v4, %s135_s20  ;;  %vm69_vm11 = vcmask 392512   ;;  %vm75_vm12 = vcmask 326912   ;;  %vm81_vm13 = vcmask 261312   ;;  %vm87_vm14 = vcmask 195712  }
   0xb   :  { %37 = vrot.lane.b32.xlu2 %v106_v5, %s136_s23  ;;  %vm93_vm15 = vcmask 130112  }
  0x12   :  { %43 = vrot.lane.b32.xlu0 %v107_v6, %s137_s28  ;;  %49 = vrot.lane.b32.xlu1 %v108_v7, %s138_s29 }
  0x13   :  { %55 = vrot.lane.b32.xlu2 %v109_v8, %s139_s3 }
  0x1a   :  { %61 = vrot.lane.b32.xlu0 %v110_v9, %s140_s8  ;;  %67 = vrot.lane.b32.xlu1 %v111_v10, %s141_s9 }
  0x1b   :  { %73 = vrot.lane.b32.xlu2 %v112_v11, %s142_s12 }
  0x22   :  { %79 = vrot.lane.b32.xlu0 %v113_v12, %s143_s17  ;;  %85 = vrot.lane.b32.xlu1 %v114_v13, %s144_s18 }
  0x23   :  { %91 = vrot.lane.b32.xlu2 %v115_v14, %s145_s21 }
  0x5d   :  { %v32_v16 = vpop.permute.xlu2 %31  }
  0x65   :  { %v38_v17 = vpop.permute.xlu2 %37  }
  0x6d   :  { %v56_v18 = vpop.permute.xlu2 %55  }
  0x74   :  { %v8_v19 = vpop.permute.xlu0 %7   ;;  %v20_v20 = vpop.permute.xlu1 %19  }
  0x75   :  { %10 = vst.msk [vmem:[#allocation0] sm:$0x1] %vm9_vm1, %v8_v19   ;;  %v74_v21 = vpop.permute.xlu2 %73  }
  0x7c   :  { %v14_v22 = vpop.permute.xlu0 %13   ;;  %v26_v23 = vpop.permute.xlu1 %25  }
  0x7d   :  { %16 = vst.msk [vmem:[#allocation0] sm:$0x1] %vm15_vm2, %v14_v22   ;;  %v92_v24 = vpop.permute.xlu2 %91  }
  0x7e   :  { %22 = vst.msk [vmem:[#allocation0] sm:$0x1] %vm21_vm3, %v20_v20  }
  0x7f   :  { %28 = vst.msk [vmem:[#allocation0] sm:$0x1] %vm27_vm4, %v26_v23  }
  0x80   :  { %34 = vst.msk [vmem:[#allocation0] sm:$0x1] %vm33_vm5, %v32_v16  }
  0x81   :  { %40 = vst.msk [vmem:[#allocation0] sm:$0x1] %vm39_vm6, %v38_v17  }
  0x84   :  { %v44_v25 = vpop.permute.xlu0 %43   ;;  %v50_v26 = vpop.permute.xlu1 %49  }
  0x85   :  { %46 = vst.msk [vmem:[#allocation0] sm:$0x1] %vm45_vm7, %v44_v25  }
  0x86   :  { %52 = vst.msk [vmem:[#allocation0] sm:$0x1] %vm51_vm8, %v50_v26  }
  0x87   :  { %58 = vst.msk [vmem:[#allocation0] sm:$0x1] %vm57_vm9, %v56_v18  }
  0x8c   :  { %v62_v27 = vpop.permute.xlu0 %61   ;;  %v68_v28 = vpop.permute.xlu1 %67  }
  0x8d   :  { %64 = vst.msk [vmem:[#allocation0] sm:$0x1] %vm63_vm10, %v62_v27  }
  0x8e   :  { %70 = vst.msk [vmem:[#allocation0] sm:$0x1] %vm69_vm11, %v68_v28  }
  0x8f   :  { %76 = vst.msk [vmem:[#allocation0] sm:$0x1] %vm75_vm12, %v74_v21  }
  0x94   :  { %v80_v29 = vpop.permute.xlu0 %79   ;;  %v86_v30 = vpop.permute.xlu1 %85  }
  0x95   :  { %82 = vst.msk [vmem:[#allocation0] sm:$0x1] %vm81_vm13, %v80_v29  }
  0x96   :  { %88 = vst.msk [vmem:[#allocation0] sm:$0x1] %vm87_vm14, %v86_v30  }
  0x97   :  { %94 = vst.msk [vmem:[#allocation0] sm:$0x1] %vm93_vm15, %v92_v24  }
  0x9e   :  { %v97_v31 = vld [vmem:[#allocation0] sm:$0x1] }
  0x9f   :  { %100 = vst [vmem:[%s208_s1] sm:$0x1] %v97_v31 }

// kernel: basic_convolutional_stem.1
= control target key start
LH: loop header
LB: loop body
LE: loop exit
PB: predicated region body
PF: predicated region fallthrough
CT: control target
= control target key end

     0   :  { %vm49_vm0 = vcmask 1041408   ;;  %vm70_vm1 = vcmask 1046528   ;;  %vm116_vm2 = vcmask 1044480   ;;  %vm93_vm3 = vcmask 1045504   ;;  %s1499_s7 = smov 48   ;;  %s1500_s8 = smov 32   ;;  %s2061_s0 = inlined_call_operand.vmem [shape: f32[2,16,16], index: 0, kind: input, shape index: {}]   ;;  %s2062_s1 = inlined_call_operand.vmem [shape: bf16[80,128], index: 1, kind: input, shape index: {}]   ;;  %s2063_s4 = inlined_call_operand.vmem [shape: f32[128,128], index: 4, kind: input, shape index: {}]   ;;  %s2064_s2 = inlined_call_operand.vmem [shape: bf16[384,128], index: 2, kind: input, shape index: {}]   ;;  %s2065_s5 = inlined_call_operand.vmem [shape: f32[6,128], index: 5, kind: input, shape index: {}]   ;;  %s2066_s3 = inlined_call_operand.vmem [shape: bf16[384,128], index: 3, kind: input, shape index: {}]   ;;  %s2067_s6 = inlined_call_operand.vmem [shape: f32[2,16,128], index: 6, kind: output, shape index: {}]  }
   0x1   :  { %v41_v0 = vld [vmem:[%s2061_s0] sm:$0xff]  ;;  %v42_v1 = vld [vmem:[%s2061_s0 + $0x8] sm:$0xff]  ;;  %v43_v2 = vld [vmem:[%s2061_s0 + $0x10] sm:$0xff]  ;;  %vm139_vm4 = vcmask 1043456   ;;  %s1501_s9 = smov 64   ;;  %vm162_vm5 = vcmask 130048  }
   0x2   :  { %v50_v3 = vrot.slane %v41_v0, 6  ;;  %v51_v4 = vrot.slane %v42_v1, 6  ;;  %v44_v5 = vld [vmem:[%s2061_s0 + $0x18] sm:$0xff]  ;;  %v1398_v6 = vld [vmem:[%s2062_s1 + $0x20] sm:$0xff]  ;;  %v53_v7 = vrot.slane %v43_v2, 6  ;;  %s1498_s0 = smov 16  }
   0x3   :  { %v54_v11 = vrot.slane %v44_v5, 6  ;;  %234 = vmatpush.bf16.msra.mxu0 %v1398_v6  ;;  %v1397_v63 = vld [vmem:[%s2062_s1 + $0x18] sm:$0xff]  ;;  %v1396_v0 = vld [vmem:[%s2062_s1 + $0x10] sm:$0xff]  ;;  %v1395_v1 = vld [vmem:[%s2062_s1 + $0x8] sm:$0xff]  ;;  %vm167_vm6 = vcmask 261120   ;;  %vm172_vm7 = vcmask 392192  }
   0x4   :  { %v1554_v8 = vsel %vm49_vm0, %v50_v3, %v51_v4  ;;  %v1557_v9 = vsel %vm49_vm0, 0.0, %v50_v3  ;;  %v64_v10 = vsel %vm49_vm0, %v51_v4, 0.0  ;;  %v1576_v32 = vsel %vm49_vm0, 0.0, %v53_v7  ;;  %v1394_v2 = vld [vmem:[%s2062_s1] sm:$0xff] }
   0x5   :  { %v71_v12 = vrot.slane %v1557_v9, 1  ;;  %v72_v13 = vrot.slane %v1554_v8, 1  ;;  %v74_v14 = vrot.slane %v64_v10, 1  ;;  %v117_v15 = vrot.slane %v1557_v9, 3 }
   0x6   :  { %v118_v16 = vrot.slane %v1554_v8, 3  ;;  %v120_v17 = vrot.slane %v64_v10, 3  ;;  %v94_v18 = vrot.slane %v1557_v9, 2  ;;  %v95_v19 = vrot.slane %v1554_v8, 2 }
   0x7   :  { %v73_v20 = vsel %vm70_vm1, %v71_v12, %v72_v13  ;;  %v75_v21 = vsel %vm70_vm1, %v72_v13, %v74_v14  ;;  %v97_v22 = vrot.slane %v64_v10, 2  ;;  %v140_v23 = vrot.slane %v1557_v9, 4  ;;  %235 = vmatpush.bf16.msra.mxu0 %v1397_v63 }
   0x8   :  { %v1452_v24 = vpack.i.bf16 %v75_v21, %v73_v20  ;;  %v119_v25 = vsel %vm116_vm2, %v117_v15, %v118_v16  ;;  %v121_v26 = vsel %vm116_vm2, %v118_v16, %v120_v17  ;;  %v141_v28 = vrot.slane %v1554_v8, 4 }
   0x9   :  { %v1462_v27 = vpack.i.bf16 %v121_v26, %v119_v25  ;;  %v143_v29 = vrot.slane %v64_v10, 4  ;;  %v96_v30 = vsel %vm93_vm3, %v94_v18, %v95_v19  ;;  %v98_v31 = vsel %vm93_vm3, %v95_v19, %v97_v22 }
   0xa   :  { %1453 = vrot.lane.b32.xlu0 %v1452_v24, %s1498_s0  ;;  %v142_v33 = vsel %vm139_vm4, %v140_v23, %v141_v28  ;;  %v1582_v35 = vsel %vm49_vm0, %v53_v7, %v54_v11  ;;  %v65_v36 = vsel %vm49_vm0, %v54_v11, 0.0  ;;  %v1457_v37 = vpack.i.bf16 %v98_v31, %v96_v30 }
   0xb   :  { %1463 = vrot.lane.b32.xlu1 %v1462_v27, %s1499_s7  ;;  %v144_v34 = vsel %vm139_vm4, %v141_v28, %v143_v29  ;;  %v122_v38 = vrot.slane %v1576_v32, 3  ;;  %v76_v39 = vrot.slane %v1576_v32, 1  ;;  %v77_v40 = vrot.slane %v1582_v35, 1  ;;  %236 = vmatpush.bf16.msra.mxu0 %v1396_v0 }
   0xc   :  { %v1467_v41 = vpack.i.bf16 %v144_v34, %v142_v33  ;;  %v123_v42 = vrot.slane %v1582_v35, 3  ;;  %v125_v43 = vrot.slane %v65_v36, 3  ;;  %v79_v44 = vrot.slane %v65_v36, 1 }
   0xd   :  { %v145_v45 = vrot.slane %v1576_v32, 4  ;;  %v146_v46 = vrot.slane %v1582_v35, 4  ;;  %v148_v47 = vrot.slane %v65_v36, 4  ;;  %v78_v48 = vsel %vm70_vm1, %v76_v39, %v77_v40 }
   0xe   :  { %v80_v49 = vsel %vm70_vm1, %v77_v40, %v79_v44  ;;  %v99_v50 = vrot.slane %v1576_v32, 2  ;;  %v100_v51 = vrot.slane %v1582_v35, 2  ;;  %v102_v52 = vrot.slane %v65_v36, 2 }
   0xf   :  { %v1472_v53 = vpack.i.bf16 %v80_v49, %v78_v48  ;;  %v124_v54 = vsel %vm116_vm2, %v122_v38, %v123_v42  ;;  %v126_v55 = vsel %vm116_vm2, %v123_v42, %v125_v43  ;;  %v147_v56 = vsel %vm139_vm4, %v145_v45, %v146_v46  ;;  %237 = vmatpush.bf16.msra.mxu0 %v1395_v1  ;;  %v1659_v48 = vld [vmem:[%s2063_s4 + $0x60] sm:$0xff]  ;;  %v1668_v49 = vld [vmem:[%s2063_s4 + $0x58] sm:$0xff] }
  0x10   :  { %v149_v57 = vsel %vm139_vm4, %v146_v46, %v148_v47  ;;  %v101_v58 = vsel %vm93_vm3, %v99_v50, %v100_v51  ;;  %v103_v59 = vsel %vm93_vm3, %v100_v51, %v102_v52  ;;  %v1482_v60 = vpack.i.bf16 %v126_v55, %v124_v54  ;;  %v1647_v46 = vld [vmem:[%s2063_s4 + $0x70] sm:$0xff]  ;;  %v1652_v47 = vld [vmem:[%s2063_s4 + $0x68] sm:$0xff]  ;;  %v1687_v52 = vld [vmem:[%s2063_s4 + $0x40] sm:$0xff] }
  0x11   :  { %1473 = vrot.lane.b32.xlu2 %v1472_v53, %s1498_s0  ;;  %v1487_v61 = vpack.i.bf16 %v149_v57, %v147_v56  ;;  %v1477_v62 = vpack.i.bf16 %v103_v59, %v101_v58  ;;  %vm177_vm8 = vcmask 523264   ;;  %vm224_vm9 = vcmask 654336   ;;  %v1675_v50 = vld [vmem:[%s2063_s4 + $0x50] sm:$0xff]  ;;  %v1680_v51 = vld [vmem:[%s2063_s4 + $0x48] sm:$0xff]  ;;  %v1696_v53 = vld [vmem:[%s2063_s4 + $0x38] sm:$0xff] }
  0x12   :  { %1458 = vrot.lane.b32.xlu0 %v1457_v37, %s1500_s8  ;;  %v1703_v54 = vld [vmem:[%s2063_s4 + $0x30] sm:$0xff]  ;;  %v1710_v55 = vld [vmem:[%s2063_s4 + $0x28] sm:$0xff]  ;;  %v1717_v56 = vld [vmem:[%s2063_s4 + $0x20] sm:$0xff]  ;;  %vm349_vm13 = vcmask 1040384   ;;  %vm1502_vm15 = vmmov 1  }
  0x13   :  { %1468 = vrot.lane.b32.xlu1 %v1467_v41, %s1501_s9  ;;  %238 = vmatpush.bf16.msra.mxu0 %v1394_v2  ;;  %v1722_v57 = vld [vmem:[%s2063_s4 + $0x18] sm:$0xff]  ;;  %v1729_v58 = vld [vmem:[%s2063_s4 + $0x10] sm:$0xff]  ;;  %vm1282_vm14 = vmneg %vm349_vm13 }
  0x14   :  { %vm1881_vm0 = vmpackc.low %vm1502_vm15, %vm1282_vm14 }
  0x19   :  { %1478 = vrot.lane.b32.xlu2 %v1477_v62, %s1500_s8 }
  0x1a   :  { %1483 = vrot.lane.b32.xlu0 %v1482_v60, %s1499_s7  ;;  %v1736_v60 = vld [vmem:[%s2063_s4 + $0x8] sm:$0xff] }
  0x1b   :  { %1488 = vrot.lane.b32.xlu1 %v1487_v61, %s1501_s9  ;;  %v1743_v61 = vld [vmem:[%s2063_s4] sm:$0xff] }
  0x6b   :  { %v1474_v5 = vpop.permute.xlu2 %1473 }
  0x6c   :  { %v1476_v26 = vunpack.i.h.bf16 %v1474_v5 }
  0x6e   :  { %v166_v31 = vsel %vm162_vm5, %v1582_v35, %v1476_v26 }
  0x73   :  { %v1479_v28 = vpop.permute.xlu2 %1478 }
  0x74   :  { %v1480_v29 = vunpack.i.l.bf16 %v1479_v28 }
  0x7c   :  { %v1454_v3 = vpop.permute.xlu0 %1453 }
  0x7d   :  { %v1464_v4 = vpop.permute.xlu1 %1463  ;;  %v1456_v6 = vunpack.i.h.bf16 %v1454_v3  ;;  %v1455_v7 = vunpack.i.l.bf16 %v1454_v3 }
  0x7e   :  { %v1466_v11 = vunpack.i.h.bf16 %v1464_v4  ;;  %v1465_v12 = vunpack.i.l.bf16 %v1464_v4 }
  0x7f   :  { %v164_v16 = vsel %vm162_vm5, %v1554_v8, %v1456_v6  ;;  %v163_v17 = vsel %vm162_vm5, %v1557_v9, %v1455_v7  ;;  %v1475_v8 = vunpack.i.l.bf16 %v1474_v5  ;;  %v1481_v9 = vunpack.i.h.bf16 %v1479_v28 }
  0x81   :  { %v165_v33 = vsel %vm162_vm5, %v1576_v32, %v1475_v8  ;;  %v171_v39 = vsel %vm167_vm6, %v166_v31, %v1481_v9  ;;  %v1640_v32 = vld [vmem:[%s2063_s4 + $0x78] sm:$0xff] }
  0x82   :  { %v170_v38 = vsel %vm167_vm6, %v165_v33, %v1480_v29  ;;  %259 = vmatpush.msra.mxu1 %v1640_v32  ;;  %298 = vmatpush.msra.mxu2 %v1640_v32  ;;  %v1414_v31 = vld [vmem:[%s2064_s2 + $0x78] sm:$0xff] }
  0x83   :  { %v1422_v33 = vld [vmem:[%s2064_s2 + $0xb8] sm:$0xff]  ;;  %615 = vmatpush.bf16.msrb.mxu0 %v1414_v31 }
  0x84   :  { %v1459_v10 = vpop.permute.xlu0 %1458  ;;  %260 = vmatpush.msra.mxu1 %v1647_v46  ;;  %299 = vmatpush.msra.mxu2 %v1647_v46 }
  0x85   :  { %v1461_v13 = vunpack.i.h.bf16 %v1459_v10  ;;  %v1460_v14 = vunpack.i.l.bf16 %v1459_v10  ;;  %v1469_v15 = vpop.permute.xlu1 %1468 }
  0x86   :  { %v1471_v18 = vunpack.i.h.bf16 %v1469_v15  ;;  %v1470_v19 = vunpack.i.l.bf16 %v1469_v15  ;;  %261 = vmatpush.msra.mxu1 %v1652_v47  ;;  %300 = vmatpush.msra.mxu2 %v1652_v47 }
  0x87   :  { %v168_v20 = vsel %vm167_vm6, %v163_v17, %v1460_v14  ;;  %v169_v21 = vsel %vm167_vm6, %v164_v16, %v1461_v13 }
  0x88   :  { %v173_v22 = vsel %vm172_vm7, %v168_v20, %v1465_v12  ;;  %v174_v23 = vsel %vm172_vm7, %v169_v21, %v1466_v11  ;;  %262 = vmatpush.msra.mxu1 %v1659_v48  ;;  %301 = vmatpush.msra.mxu2 %v1659_v48 }
  0x89   :  { %v178_v24 = vsel %vm177_vm8, %v173_v22, %v1470_v19  ;;  %v179_v25 = vsel %vm177_vm8, %v174_v23, %v1471_v18 }
  0x8a   :  { %v182_v27 = vpack.c.bf16 %v179_v25, %v178_v24  ;;  %263 = vmatpush.msra.mxu1 %v1668_v49  ;;  %302 = vmatpush.msra.mxu2 %v1668_v49 }
  0x8c   :  { %1184 = vmatmul.msk.bf16.vlgmr.msra.gmra.mxu0 %vm224_vm9, %v182_v27  ;;  %v1484_v30 = vpop.permute.xlu0 %1483  ;;  %264 = vmatpush.msra.mxu1 %v1675_v50 }
  0x8d   :  { %v1486_v34 = vunpack.i.h.bf16 %v1484_v30  ;;  %v1485_v36 = vunpack.i.l.bf16 %v1484_v30  ;;  %v1489_v37 = vpop.permute.xlu1 %1488  ;;  %303 = vmatpush.msra.mxu2 %v1675_v50  ;;  %v1406_v30 = vld [vmem:[%s2064_s2 + $0x38] sm:$0xff] }
  0x8e   :  { %v1491_v40 = vunpack.i.h.bf16 %v1489_v37  ;;  %v1490_v41 = vunpack.i.l.bf16 %v1489_v37  ;;  %265 = vmatpush.msra.mxu1 %v1680_v51  ;;  %596 = vmatpush.bf16.msra.mxu3 %v1406_v30  ;;  %v1421_v37 = vld [vmem:[%s2064_s2 + $0xb0] sm:$0xff] }
  0x8f   :  { %v176_v42 = vsel %vm172_vm7, %v171_v39, %v1486_v34  ;;  %v175_v43 = vsel %vm172_vm7, %v170_v38, %v1485_v36  ;;  %304 = vmatpush.msra.mxu2 %v1680_v51  ;;  %v1405_v34 = vld [vmem:[%s2064_s2 + $0x30] sm:$0xff]  ;;  %v1404_v38 = vld [vmem:[%s2064_s2 + $0x28] sm:$0xff] }
  0x90   :  { %v180_v44 = vsel %vm177_vm8, %v175_v43, %v1490_v41  ;;  %v181_v35 = vsel %vm177_vm8, %v176_v42, %v1491_v40  ;;  %266 = vmatpush.msra.mxu1 %v1687_v52  ;;  %v1413_v36 = vld [vmem:[%s2064_s2 + $0x70] sm:$0xff]  ;;  %v1412_v39 = vld [vmem:[%s2064_s2 + $0x68] sm:$0xff]  ;;  %v1403_v41 = vld [vmem:[%s2064_s2 + $0x20] sm:$0xff] }
  0x91   :  { %v183_v45 = vpack.c.bf16 %v181_v35, %v180_v44  ;;  %305 = vmatpush.msra.mxu2 %v1687_v52  ;;  %616 = vmatpush.bf16.msrb.mxu0 %v1413_v36  ;;  %v1420_v40 = vld [vmem:[%s2064_s2 + $0xa8] sm:$0xff]  ;;  %v1411_v42 = vld [vmem:[%s2064_s2 + $0x60] sm:$0xff]  ;;  %v1402_v44 = vld [vmem:[%s2064_s2 + $0x18] sm:$0xff] }
  0x92   :  { %267 = vmatpush.msra.mxu1 %v1696_v53  ;;  %597 = vmatpush.bf16.msra.mxu3 %v1405_v34  ;;  %v1419_v43 = vld [vmem:[%s2064_s2 + $0xa0] sm:$0xff]  ;;  %v1410_v35 = vld [vmem:[%s2064_s2 + $0x58] sm:$0xff] }
  0x93   :  { %306 = vmatpush.msra.mxu2 %v1696_v53 }
  0x94   :  { %268 = vmatpush.msra.mxu1 %v1703_v54 }
  0x95   :  { %307 = vmatpush.msra.mxu2 %v1703_v54  ;;  %617 = vmatpush.bf16.msrb.mxu0 %v1412_v39 }
  0x96   :  { %269 = vmatpush.msra.mxu1 %v1710_v55  ;;  %598 = vmatpush.bf16.msra.mxu3 %v1404_v38 }
  0x97   :  { %308 = vmatpush.msra.mxu2 %v1710_v55 }
  0x98   :  { %270 = vmatpush.msra.mxu1 %v1717_v56 }
  0x99   :  { %309 = vmatpush.msra.mxu2 %v1717_v56  ;;  %618 = vmatpush.bf16.msrb.mxu0 %v1411_v42 }
  0x9a   :  { %271 = vmatpush.msra.mxu1 %v1722_v57  ;;  %599 = vmatpush.bf16.msra.mxu3 %v1403_v41 }
  0x9b   :  { %310 = vmatpush.msra.mxu2 %v1722_v57 }
  0x9c   :  { %1185 = vmatmul.msk.bf16.gmra.mxu0 %vm224_vm9, %v183_v45  ;;  %272 = vmatpush.msra.mxu1 %v1729_v58  ;;  %v1418_v45 = vld [vmem:[%s2064_s2 + $0x98] sm:$0xff] }
  0x9d   :  { %311 = vmatpush.msra.mxu2 %v1729_v58  ;;  %619 = vmatpush.bf16.msrb.mxu0 %v1410_v35 }
  0x9e   :  { %273 = vmatpush.msra.mxu1 %v1736_v60  ;;  %600 = vmatpush.bf16.msra.mxu3 %v1402_v44 }
  0x9f   :  { %312 = vmatpush.msra.mxu2 %v1736_v60 }
  0xa0   :  { %274 = vmatpush.msra.mxu1 %v1743_v61 }
  0xa1   :  { %313 = vmatpush.msra.mxu2 %v1743_v61 }
  0xa2   :  { %634 = vmatpush.bf16.msrb.mxu1 %v1422_v33 }
  0xa3   :  { %662 = vmatpush.msrb.mxu2 %v1640_v32 }
  0xa5   :  { %663 = vmatpush.msrb.mxu2 %v1647_v46 }
  0xa6   :  { %635 = vmatpush.bf16.msrb.mxu1 %v1421_v37 }
  0xa7   :  { %664 = vmatpush.msrb.mxu2 %v1652_v47 }
  0xa9   :  { %665 = vmatpush.msrb.mxu2 %v1659_v48 }
  0xaa   :  { %636 = vmatpush.bf16.msrb.mxu1 %v1420_v40 }
  0xab   :  { %666 = vmatpush.msrb.mxu2 %v1668_v49 }
  0xad   :  { %667 = vmatpush.msrb.mxu2 %v1675_v50 }
  0xae   :  { %637 = vmatpush.bf16.msrb.mxu1 %v1419_v43 }
  0xaf   :  { %668 = vmatpush.msrb.mxu2 %v1680_v51 }
  0xb1   :  { %669 = vmatpush.msrb.mxu2 %v1687_v52 }
  0xb2   :  { %638 = vmatpush.bf16.msrb.mxu1 %v1418_v45 }
  0xb3   :  { %670 = vmatpush.msrb.mxu2 %v1696_v53 }
  0xb5   :  { %671 = vmatpush.msrb.mxu2 %v1703_v54 }
  0xb7   :  { %672 = vmatpush.msrb.mxu2 %v1710_v55 }
  0xb9   :  { %673 = vmatpush.msrb.mxu2 %v1717_v56 }
  0xbb   :  { %674 = vmatpush.msrb.mxu2 %v1722_v57 }
  0xbd   :  { %675 = vmatpush.msrb.mxu2 %v1729_v58 }
  0xbf   :  { %676 = vmatpush.msrb.mxu2 %v1736_v60 }
  0xc1   :  { %677 = vmatpush.msrb.mxu2 %v1743_v61 }
 0x109   :  { %v240_v59 = vpop.f32.mrf.mxu0 }
 0x111   :  { %v242_v62 = vpop.f32.mrf.mxu0 }
 0x112   :  { %v250_v0 = vadd.f32 %v242_v62, %v240_v59 }
 0x119   :  { %v245_v63 = vpop.f32.mrf.mxu0 }
 0x11a   :  { %v251_v1 = vadd.f32 %v250_v0, %v245_v63  ;;  %v1400_v0 = vld [vmem:[%s2064_s2 + $0x8] sm:$0xff] }
 0x121   :  { %v247_v2 = vpop.f32.mrf.mxu0 }
 0x122   :  { %v252_v3 = vadd.f32 %v251_v1, %v247_v2  ;;  %v1408_v1 = vld [vmem:[%s2064_s2 + $0x48] sm:$0xff] }
 0x124   :  { %v253_v4 = vrot.slane %v252_v3, 4 }
 0x126   :  { %v254_v5 = vadd.f32 %v253_v4, %v252_v3  ;;  %v1399_v3 = vld [vmem:[%s2064_s2] sm:$0xff] }
 0x128   :  { %v255_v6 = vrot.slane %v254_v5, 2 }
 0x12a   :  { %v256_v7 = vadd.f32 %v255_v6, %v254_v5 }
 0x12c   :  { %v257_v10 = vrot.slane %v256_v7, 1 }
 0x12e   :  { %v258_v11 = vadd.f32 %v257_v10, %v256_v7  ;;  %v1407_v7 = vld [vmem:[%s2064_s2 + $0x40] sm:$0xff] }
 0x12f   :  { %v1415_v10 = vld [vmem:[%s2064_s2 + $0x80] sm:$0xff] }
 0x130   :  { %275 = vmatmul.f32.vlgmr.msra.gmra.mxu1 %v258_v11 }
 0x1ad   :  { %v276_v12 = vpop.f32.mrf.mxu1 }
 0x1ae   :  { %v279_v13 = vmul.f32 0.001953125, %v276_v12 }
 0x1b0   :  { %v280_v14 = vperm.slane %v279_v13, 0 }
 0x1b2   :  { %v1765_v15 = vsub.f32 %v240_v59, %v280_v14  ;;  %v1767_v16 = vsub.f32 %v242_v62, %v280_v14  ;;  %v1769_v17 = vsub.f32 %v245_v63, %v280_v14  ;;  %v1771_v18 = vsub.f32 %v247_v2, %v280_v14  ;;  %v1401_v59 = vld [vmem:[%s2064_s2 + $0x10] sm:$0xff]  ;;  %v1416_v2 = vld [vmem:[%s2064_s2 + $0x88] sm:$0xff] }
 0x1b3   :  { %v1409_v62 = vld [vmem:[%s2064_s2 + $0x50] sm:$0xff]  ;;  %601 = vmatpush.bf16.msra.mxu3 %v1401_v59 }
 0x1b4   :  { %v285_v19 = vmul.f32 %v1765_v15, %v1765_v15  ;;  %v286_v20 = vmul.f32 %v1767_v16, %v1767_v16  ;;  %v287_v21 = vmul.f32 %v1769_v17, %v1769_v17  ;;  %v288_v23 = vmul.f32 %v1771_v18, %v1771_v18  ;;  %v1417_v63 = vld [vmem:[%s2064_s2 + $0x90] sm:$0xff]  ;;  %620 = vmatpush.bf16.msrb.mxu0 %v1409_v62 }
 0x1b5   :  { %639 = vmatpush.bf16.msrb.mxu1 %v1417_v63 }
 0x1b6   :  { %v289_v22 = vadd.f32 %v286_v20, %v285_v19  ;;  %v1864_v20 = vld [vmem:[%s2065_s5] sm:$0x3f] }
 0x1b7   :  { %602 = vmatpush.bf16.msra.mxu3 %v1400_v0 }
 0x1b8   :  { %v290_v24 = vadd.f32 %v289_v22, %v287_v21  ;;  %621 = vmatpush.bf16.msrb.mxu0 %v1408_v1 }
 0x1b9   :  { %640 = vmatpush.bf16.msrb.mxu1 %v1416_v2 }
 0x1ba   :  { %v291_v25 = vadd.f32 %v290_v24, %v288_v23 }
 0x1bb   :  { %603 = vmatpush.bf16.msra.mxu3 %v1399_v3 }
 0x1bc   :  { %v292_v26 = vrot.slane %v291_v25, 4  ;;  %622 = vmatpush.bf16.msrb.mxu0 %v1407_v7 }
 0x1bd   :  { %641 = vmatpush.bf16.msrb.mxu1 %v1415_v10 }
 0x1be   :  { %v293_v8 = vadd.f32 %v292_v26, %v291_v25  ;;  %v336_v25 = vperm.slane %v1864_v20, 1 }
 0x1bf   :  { %701 = vmatpush.msrb.mxu3 %v1640_v32 }
 0x1c0   :  { %v294_v27 = vrot.slane %v293_v8, 2 }
 0x1c1   :  { %702 = vmatpush.msrb.mxu3 %v1647_v46 }
 0x1c2   :  { %v295_v28 = vadd.f32 %v294_v27, %v293_v8 }
 0x1c3   :  { %703 = vmatpush.msrb.mxu3 %v1652_v47 }
 0x1c4   :  { %v296_v9 = vrot.slane %v295_v28, 1 }
 0x1c5   :  { %704 = vmatpush.msrb.mxu3 %v1659_v48 }
 0x1c6   :  { %v297_v29 = vadd.f32 %v296_v9, %v295_v28 }
 0x1c7   :  { %705 = vmatpush.msrb.mxu3 %v1668_v49 }
 0x1c8   :  { %314 = vmatmul.f32.vlgmr.msra.gmra.mxu2 %v297_v29 }
 0x1c9   :  { %706 = vmatpush.msrb.mxu3 %v1675_v50 }
 0x1cb   :  { %707 = vmatpush.msrb.mxu3 %v1680_v51 }
 0x1cd   :  { %708 = vmatpush.msrb.mxu3 %v1687_v52 }
 0x1cf   :  { %709 = vmatpush.msrb.mxu3 %v1696_v53 }
 0x1d1   :  { %710 = vmatpush.msrb.mxu3 %v1703_v54 }
 0x1d3   :  { %711 = vmatpush.msrb.mxu3 %v1710_v55 }
 0x1d5   :  { %712 = vmatpush.msrb.mxu3 %v1717_v56 }
 0x1d7   :  { %713 = vmatpush.msrb.mxu3 %v1722_v57 }
 0x1d9   :  { %714 = vmatpush.msrb.mxu3 %v1729_v58 }
 0x1db   :  { %715 = vmatpush.msrb.mxu3 %v1736_v60 }
 0x1dd   :  { %716 = vmatpush.msrb.mxu3 %v1743_v61 }
 0x24b   :  { %v315_v4 = vpop.f32.mrf.mxu2 }
 0x24c   :  { %v318_v5 = vmul.f32 0.001953125, %v315_v4 }
 0x24e   :  { %v319_v6 = vadd.f32 1e-05, %v318_v5 }
 0x250   :  { %1492 = vrsqrt.f32 %v319_v6  ;;  %vm326_vm11 = vweird.f32 %v319_v6 }
 0x256   :  { %v1493_v11 = vpop.eup %1492 }
 0x257   :  { %v321_v12 = vmul.f32 %v1493_v11, %v319_v6  ;;  %vm327_vm10 = vweird.f32 %v1493_v11 }
 0x258   :  { %vm328_vm12 = vmor %vm326_vm11, %vm327_vm10 }
 0x259   :  { %v322_v13 = vmul.f32 %v1493_v11, %v321_v12 }
 0x25b   :  { %v323_v14 = vmul.f32 0.5, %v322_v13 }
 0x25d   :  { %v324_v19 = vsub.f32 1.5, %v323_v14 }
 0x25f   :  { %v325_v21 = vmul.f32 %v1493_v11, %v324_v19 }
 0x261   :  { %v329_v22 = vsel %vm328_vm12, %v1493_v11, %v325_v21 }
 0x262   :  { %v330_v23 = vmul.f32 %v329_v22, %v1864_v20 }
 0x264   :  { %v331_v24 = vperm.slane %v330_v23, 0 }
 0x266   :  { %v332_v26 = vmul.f32 %v331_v24, %v1765_v15  ;;  %v333_v8 = vmul.f32 %v331_v24, %v1767_v16  ;;  %v334_v27 = vmul.f32 %v331_v24, %v1769_v17  ;;  %v335_v29 = vmul.f32 %v331_v24, %v1771_v18 }
 0x268   :  { %v337_v28 = vadd.f32 %v336_v25, %v332_v26  ;;  %v338_v9 = vadd.f32 %v336_v25, %v333_v8  ;;  %v339_v33 = vadd.f32 %v336_v25, %v334_v27  ;;  %v340_v34 = vadd.f32 %v336_v25, %v335_v29 }
 0x26a   :  { %v341_v30 = vmax.f32 %v337_v28, 0.0  ;;  %v342_v31 = vmax.f32 %v338_v9, 0.0  ;;  %v343_v38 = vmax.f32 %v339_v33, 0.0  ;;  %v344_v45 = vmax.f32 %v340_v34, 0.0 }
 0x26c   :  { %v350_v15 = vrot.slane %v341_v30, 7  ;;  %v351_v16 = vrot.slane %v342_v31, 7  ;;  %v353_v3 = vrot.slane %v343_v38, 7  ;;  %v354_v4 = vrot.slane %v344_v45, 7 }
 0x26e   :  { %v352_v17 = vsel %vm349_vm13, %v350_v15, %v351_v16  ;;  %v362_v18 = vsel %vm349_vm13, 0.0, %v350_v15  ;;  %v364_v37 = vsel %vm349_vm13, %v351_v16, 0.0  ;;  %v355_v5 = vsel %vm349_vm13, %v353_v3, %v354_v4 }
 0x26f   :  { %v371_v39 = vrot.slane %v352_v17, 1  ;;  %v385_v40 = vrot.slane %v352_v17, 2  ;;  %v1284_v41 = vpack.c.bf16 %v352_v17, %v350_v15  ;;  %v370_v42 = vrot.slane %v362_v18, 1 }
 0x270   :  { %v373_v43 = vrot.slane %v364_v37, 1  ;;  %v384_v44 = vrot.slane %v362_v18, 2  ;;  %v387_v35 = vrot.slane %v364_v37, 2  ;;  %v363_v6 = vsel %vm349_vm13, 0.0, %v353_v3 }
 0x271   :  { %1285 = vmatmul.msk.bf16.vlgmr.msra.gmra.mxu3 %vm1881_vm0, %v1284_v41  ;;  %v372_v59 = vsel %vm70_vm1, %v370_v42, %v371_v39  ;;  %v365_v7 = vsel %vm349_vm13, %v354_v4, 0.0  ;;  %v375_v10 = vrot.slane %v363_v6, 1  ;;  %v376_v11 = vrot.slane %v355_v5, 1 }
 0x272   :  { %v374_v62 = vsel %vm70_vm1, %v371_v39, %v373_v43  ;;  %v386_v63 = vsel %vm93_vm3, %v384_v44, %v385_v40  ;;  %v388_v0 = vsel %vm93_vm3, %v385_v40, %v387_v35  ;;  %1067 = vmatpush.msra.mxu3 %v1640_v32  ;;  %v378_v12 = vrot.slane %v365_v7, 1 }
 0x273   :  { %v399_v1 = vpack.c.bf16 %v374_v62, %v372_v59  ;;  %v400_v2 = vpack.c.bf16 %v388_v0, %v386_v63  ;;  %v389_v13 = vrot.slane %v363_v6, 2  ;;  %v390_v14 = vrot.slane %v355_v5, 2 }
 0x274   :  { %1068 = vmatpush.msra.mxu3 %v1647_v46  ;;  %v392_v19 = vrot.slane %v365_v7, 2  ;;  %v1288_v21 = vpack.c.bf16 %v355_v5, %v353_v3  ;;  %v377_v22 = vsel %vm70_vm1, %v375_v10, %v376_v11  ;;  %v379_v23 = vsel %vm70_vm1, %v376_v11, %v378_v12 }
 0x275   :  { %623 = vmatmul.bf16.vlgmr.msrb.gmra.mxu0 %v399_v1  ;;  %642 = vmatmul.bf16.vlgmr.msrb.gmra.mxu1 %v400_v2  ;;  %v391_v24 = vsel %vm93_vm3, %v389_v13, %v390_v14  ;;  %v402_v26 = vpack.c.bf16 %v379_v23, %v377_v22 }
 0x276   :  { %1069 = vmatpush.msra.mxu3 %v1652_v47  ;;  %v393_v25 = vsel %vm93_vm3, %v390_v14, %v392_v19 }
 0x277   :  { %v403_v8 = vpack.c.bf16 %v393_v25, %v391_v24 }
 0x278   :  { %1070 = vmatpush.msra.mxu3 %v1659_v48 }
 0x27a   :  { %1071 = vmatpush.msra.mxu3 %v1668_v49 }
 0x27c   :  { %1072 = vmatpush.msra.mxu3 %v1675_v50 }
 0x27e   :  { %1073 = vmatpush.msra.mxu3 %v1680_v51 }
 0x280   :  { %1074 = vmatpush.msra.mxu3 %v1687_v52 }
 0x281   :  { %1289 = vmatmul.msk.bf16.gmra.mxu3 %vm1881_vm0, %v1288_v21 }
 0x282   :  { %1075 = vmatpush.msra.mxu3 %v1696_v53 }
 0x284   :  { %1076 = vmatpush.msra.mxu3 %v1703_v54 }
 0x285   :  { %628 = vmatmul.bf16.gmra.mxu0 %v402_v26  ;;  %647 = vmatmul.bf16.gmra.mxu1 %v403_v8 }
 0x286   :  { %1077 = vmatpush.msra.mxu3 %v1710_v55 }
 0x288   :  { %1078 = vmatpush.msra.mxu3 %v1717_v56 }
 0x28a   :  { %1079 = vmatpush.msra.mxu3 %v1722_v57 }
 0x28c   :  { %1080 = vmatpush.msra.mxu3 %v1729_v58 }
 0x28e   :  { %1081 = vmatpush.msra.mxu3 %v1736_v60 }
 0x290   :  { %1082 = vmatpush.msra.mxu3 %v1743_v61 }
 0x2f2   :  { %v624_v27 = vpop.f32.mrf.mxu0  ;;  %v643_v28 = vpop.f32.mrf.mxu1 }
 0x2f4   :  { %v605_v9 = vpop.f32.mrf.mxu3 }
 0x2f5   :  { %v625_v17 = vadd.f32 %v624_v27, %v605_v9 }
 0x2f7   :  { %v644_v38 = vadd.f32 %v643_v28, %v625_v17  ;;  %v1436_v17 = vld [vmem:[%s2066_s3 + $0x68] sm:$0xff] }
 0x2fa   :  { %v626_v29 = vpop.f32.mrf.mxu0  ;;  %v645_v30 = vpop.f32.mrf.mxu1 }
 0x2fc   :  { %v607_v31 = vpop.f32.mrf.mxu3 }
 0x2fd   :  { %v627_v34 = vadd.f32 %v626_v29, %v607_v31  ;;  %v1430_v29 = vld [vmem:[%s2066_s3 + $0x38] sm:$0xff] }
 0x2fe   :  { %1001 = vmatpush.bf16.msra.mxu0 %v1430_v29  ;;  %v1446_v31 = vld [vmem:[%s2066_s3 + $0xb8] sm:$0xff] }
 0x2ff   :  { %v646_v37 = vadd.f32 %v645_v30, %v627_v34  ;;  %v1438_v30 = vld [vmem:[%s2066_s3 + $0x78] sm:$0xff]  ;;  %1039 = vmatpush.bf16.msra.mxu2 %v1446_v31  ;;  %v1428_v34 = vld [vmem:[%s2066_s3 + $0x28] sm:$0xff] }
 0x300   :  { %1020 = vmatpush.bf16.msra.mxu1 %v1438_v30 }
 0x301   :  { %v653_v42 = vadd.f32 %v646_v37, %v644_v38 }
 0x302   :  { %v629_v33 = vpop.f32.mrf.mxu0  ;;  %v648_v15 = vpop.f32.mrf.mxu1 }
 0x304   :  { %v610_v16 = vpop.f32.mrf.mxu3 }
 0x305   :  { %v630_v18 = vadd.f32 %v629_v33, %v610_v16  ;;  %v1429_v33 = vld [vmem:[%s2066_s3 + $0x30] sm:$0xff] }
 0x306   :  { %1002 = vmatpush.bf16.msra.mxu0 %v1429_v33  ;;  %v1445_v16 = vld [vmem:[%s2066_s3 + $0xb0] sm:$0xff] }
 0x307   :  { %v649_v39 = vadd.f32 %v648_v15, %v630_v18  ;;  %v1437_v15 = vld [vmem:[%s2066_s3 + $0x70] sm:$0xff]  ;;  %1040 = vmatpush.bf16.msra.mxu2 %v1445_v16  ;;  %v1444_v18 = vld [vmem:[%s2066_s3 + $0xa8] sm:$0xff] }
 0x308   :  { %1021 = vmatpush.bf16.msra.mxu1 %v1437_v15 }
 0x309   :  { %v654_v35 = vadd.f32 %v653_v42, %v649_v39  ;;  %v1442_v42 = vld [vmem:[%s2066_s3 + $0x98] sm:$0xff] }
 0x30a   :  { %v631_v40 = vpop.f32.mrf.mxu0  ;;  %v650_v44 = vpop.f32.mrf.mxu1  ;;  %1003 = vmatpush.bf16.msra.mxu0 %v1428_v34 }
 0x30b   :  { %1041 = vmatpush.bf16.msra.mxu2 %v1444_v18 }
 0x30c   :  { %v612_v41 = vpop.f32.mrf.mxu3  ;;  %1022 = vmatpush.bf16.msra.mxu1 %v1436_v17 }
 0x30d   :  { %v632_v43 = vadd.f32 %v631_v40, %v612_v41  ;;  %v1426_v40 = vld [vmem:[%s2066_s3 + $0x18] sm:$0xff] }
 0x30e   :  { %v1434_v41 = vld [vmem:[%s2066_s3 + $0x58] sm:$0xff] }
 0x30f   :  { %v651_v45 = vadd.f32 %v650_v44, %v632_v43  ;;  %v1425_v43 = vld [vmem:[%s2066_s3 + $0x10] sm:$0xff] }
 0x311   :  { %v655_v59 = vadd.f32 %v654_v35, %v651_v45 }
 0x313   :  { %v656_v62 = vrot.slane %v655_v59, 4 }
 0x315   :  { %v657_v63 = vadd.f32 %v656_v62, %v655_v59  ;;  %v1441_v59 = vld [vmem:[%s2066_s3 + $0x90] sm:$0xff]  ;;  %v1424_v62 = vld [vmem:[%s2066_s3 + $0x8] sm:$0xff] }
 0x317   :  { %v658_v0 = vrot.slane %v657_v63, 2 }
 0x319   :  { %v659_v1 = vadd.f32 %v658_v0, %v657_v63  ;;  %v1432_v0 = vld [vmem:[%s2066_s3 + $0x48] sm:$0xff] }
 0x31b   :  { %v660_v2 = vrot.slane %v659_v1, 1 }
 0x31d   :  { %v661_v3 = vadd.f32 %v660_v2, %v659_v1  ;;  %v1440_v1 = vld [vmem:[%s2066_s3 + $0x88] sm:$0xff]  ;;  %v1423_v2 = vld [vmem:[%s2066_s3] sm:$0xff] }
 0x31f   :  { %678 = vmatmul.f32.vlgmr.msrb.gmra.mxu2 %v661_v3  ;;  %v1431_v3 = vld [vmem:[%s2066_s3 + $0x40] sm:$0xff] }
 0x3a2   :  { %v679_v4 = vpop.f32.mrf.mxu2 }
 0x3a3   :  { %v682_v5 = vmul.f32 0.001953125, %v679_v4  ;;  %v1439_v4 = vld [vmem:[%s2066_s3 + $0x80] sm:$0xff] }
 0x3a5   :  { %v683_v6 = vperm.slane %v682_v5, 0 }
 0x3a7   :  { %v1919_v7 = vsub.f32 %v644_v38, %v683_v6  ;;  %v1921_v10 = vsub.f32 %v646_v37, %v683_v6  ;;  %v1923_v11 = vsub.f32 %v649_v39, %v683_v6  ;;  %v1925_v12 = vsub.f32 %v651_v45, %v683_v6  ;;  %v1427_v37 = vld [vmem:[%s2066_s3 + $0x20] sm:$0xff]  ;;  %v1433_v45 = vld [vmem:[%s2066_s3 + $0x50] sm:$0xff] }
 0x3a8   :  { %1004 = vmatpush.bf16.msra.mxu0 %v1427_v37  ;;  %v1435_v38 = vld [vmem:[%s2066_s3 + $0x60] sm:$0xff] }
 0x3a9   :  { %v688_v13 = vmul.f32 %v1919_v7, %v1919_v7  ;;  %v689_v14 = vmul.f32 %v1921_v10, %v1921_v10  ;;  %v690_v19 = vmul.f32 %v1923_v11, %v1923_v11  ;;  %v691_v22 = vmul.f32 %v1925_v12, %v1925_v12  ;;  %v1443_v39 = vld [vmem:[%s2066_s3 + $0xa0] sm:$0xff]  ;;  %1023 = vmatpush.bf16.msra.mxu1 %v1435_v38 }
 0x3aa   :  { %1042 = vmatpush.bf16.msra.mxu2 %v1443_v39 }
 0x3ab   :  { %v692_v21 = vadd.f32 %v689_v14, %v688_v13 }
 0x3ac   :  { %1005 = vmatpush.bf16.msra.mxu0 %v1426_v40 }
 0x3ad   :  { %v693_v23 = vadd.f32 %v692_v21, %v690_v19  ;;  %1024 = vmatpush.bf16.msra.mxu1 %v1434_v41 }
 0x3ae   :  { %1043 = vmatpush.bf16.msra.mxu2 %v1442_v42 }
 0x3af   :  { %v694_v24 = vadd.f32 %v693_v23, %v691_v22  ;;  %v742_v23 = vperm.slane %v1864_v20, 3 }
 0x3b0   :  { %1006 = vmatpush.bf16.msra.mxu0 %v1425_v43 }
 0x3b1   :  { %v695_v25 = vrot.slane %v694_v24, 4  ;;  %1025 = vmatpush.bf16.msra.mxu1 %v1433_v45 }
 0x3b2   :  { %1044 = vmatpush.bf16.msra.mxu2 %v1441_v59 }
 0x3b3   :  { %v696_v26 = vadd.f32 %v695_v25, %v694_v24 }
 0x3b4   :  { %1007 = vmatpush.bf16.msra.mxu0 %v1424_v62 }
 0x3b5   :  { %v697_v8 = vrot.slane %v696_v26, 2  ;;  %1026 = vmatpush.bf16.msra.mxu1 %v1432_v0 }
 0x3b6   :  { %1045 = vmatpush.bf16.msra.mxu2 %v1440_v1 }
 0x3b7   :  { %v698_v27 = vadd.f32 %v697_v8, %v696_v26 }
 0x3b8   :  { %1008 = vmatpush.bf16.msra.mxu0 %v1423_v2 }
 0x3b9   :  { %v699_v28 = vrot.slane %v698_v27, 1  ;;  %1027 = vmatpush.bf16.msra.mxu1 %v1431_v3 }
 0x3ba   :  { %1046 = vmatpush.bf16.msra.mxu2 %v1439_v4 }
 0x3bb   :  { %v700_v9 = vadd.f32 %v699_v28, %v698_v27 }
 0x3bc   :  { %1106 = vmatpush.msrb.mxu0 %v1640_v32 }
 0x3bd   :  { %717 = vmatmul.f32.vlgmr.msrb.gmra.mxu3 %v700_v9 }
 0x3be   :  { %1107 = vmatpush.msrb.mxu0 %v1647_v46 }
 0x3c0   :  { %1108 = vmatpush.msrb.mxu0 %v1652_v47 }
 0x3c2   :  { %1109 = vmatpush.msrb.mxu0 %v1659_v48 }
 0x3c4   :  { %1110 = vmatpush.msrb.mxu0 %v1668_v49 }
 0x3c6   :  { %1111 = vmatpush.msrb.mxu0 %v1675_v50 }
 0x3c8   :  { %1112 = vmatpush.msrb.mxu0 %v1680_v51 }
 0x3ca   :  { %1113 = vmatpush.msrb.mxu0 %v1687_v52 }
 0x3cc   :  { %1114 = vmatpush.msrb.mxu0 %v1696_v53 }
 0x3ce   :  { %1115 = vmatpush.msrb.mxu0 %v1703_v54 }
 0x3d0   :  { %1116 = vmatpush.msrb.mxu0 %v1710_v55 }
 0x3d2   :  { %1117 = vmatpush.msrb.mxu0 %v1717_v56 }
 0x3d4   :  { %1118 = vmatpush.msrb.mxu0 %v1722_v57 }
 0x3d6   :  { %1119 = vmatpush.msrb.mxu0 %v1729_v58 }
 0x3d8   :  { %1120 = vmatpush.msrb.mxu0 %v1736_v60 }
 0x3da   :  { %1121 = vmatpush.msrb.mxu0 %v1743_v61 }
 0x440   :  { %v718_v44 = vpop.f32.mrf.mxu3 }
 0x441   :  { %v721_v35 = vmul.f32 0.001953125, %v718_v44 }
 0x443   :  { %v722_v63 = vadd.f32 1e-05, %v721_v35 }
 0x445   :  { %1494 = vrsqrt.f32 %v722_v63  ;;  %vm729_vm4 = vweird.f32 %v722_v63 }
 0x44b   :  { %v1495_v5 = vpop.eup %1494 }
 0x44c   :  { %v724_v6 = vmul.f32 %v1495_v5, %v722_v63  ;;  %vm730_vm2 = vweird.f32 %v1495_v5 }
 0x44d   :  { %vm731_vm5 = vmor %vm729_vm4, %vm730_vm2 }
 0x44e   :  { %v725_v13 = vmul.f32 %v1495_v5, %v724_v6 }
 0x450   :  { %v726_v14 = vmul.f32 0.5, %v725_v13 }
 0x452   :  { %v727_v19 = vsub.f32 1.5, %v726_v14 }
 0x454   :  { %v728_v21 = vmul.f32 %v1495_v5, %v727_v19 }
 0x456   :  { %v732_v22 = vsel %vm731_vm5, %v1495_v5, %v728_v21 }
 0x457   :  { %v734_v32 = vrot.slane %v732_v22, 6 }
 0x459   :  { %v736_v46 = vmul.f32 %v734_v32, %v1864_v20 }
 0x45b   :  { %v737_v47 = vperm.slane %v736_v46, 2 }
 0x45d   :  { %v739_v48 = vmul.f32 %v737_v47, %v1921_v10  ;;  %v738_v49 = vmul.f32 %v737_v47, %v1919_v7  ;;  %v740_v24 = vmul.f32 %v737_v47, %v1923_v11  ;;  %v741_v51 = vmul.f32 %v737_v47, %v1925_v12 }
 0x45f   :  { %v743_v50 = vadd.f32 %v742_v23, %v738_v49  ;;  %v744_v25 = vadd.f32 %v742_v23, %v739_v48  ;;  %v745_v8 = vadd.f32 %v742_v23, %v740_v24  ;;  %v746_v10 = vadd.f32 %v742_v23, %v741_v51 }
 0x461   :  { %v747_v52 = vmax.f32 %v743_v50, 0.0  ;;  %v748_v26 = vmax.f32 %v744_v25, 0.0  ;;  %v749_v28 = vmax.f32 %v745_v8, 0.0  ;;  %v750_v33 = vmax.f32 %v746_v10, 0.0 }
 0x463   :  { %v755_v53 = vrot.slane %v747_v52, 7  ;;  %v756_v27 = vrot.slane %v748_v26, 7  ;;  %v758_v58 = vrot.slane %v749_v28, 7  ;;  %v759_v37 = vrot.slane %v750_v33, 7 }
 0x465   :  { %v757_v7 = vsel %vm349_vm13, %v755_v53, %v756_v27  ;;  %v767_v54 = vsel %vm349_vm13, 0.0, %v755_v53  ;;  %v769_v11 = vsel %vm349_vm13, %v756_v27, 0.0  ;;  %v760_v38 = vsel %vm349_vm13, %v758_v58, %v759_v37 }
 0x466   :  { %v1388_v12 = vpack.c.bf16 %v757_v7, %v755_v53  ;;  %v775_v9 = vrot.slane %v767_v54, 1  ;;  %v776_v55 = vrot.slane %v757_v7, 1  ;;  %v778_v29 = vrot.slane %v769_v11, 1 }
 0x467   :  { %v789_v30 = vrot.slane %v767_v54, 2  ;;  %v790_v56 = vrot.slane %v757_v7, 2  ;;  %v792_v31 = vrot.slane %v769_v11, 2  ;;  %v768_v39 = vsel %vm349_vm13, 0.0, %v758_v58 }
 0x468   :  { %1389 = vmatmul.msk.bf16.vlgmr.msra.gmra.mxu0 %vm1881_vm0, %v1388_v12  ;;  %v777_v57 = vsel %vm70_vm1, %v775_v9, %v776_v55  ;;  %v779_v15 = vsel %vm70_vm1, %v776_v55, %v778_v29  ;;  %v770_v40 = vsel %vm349_vm13, %v759_v37, 0.0  ;;  %v780_v41 = vrot.slane %v768_v39, 1 }
 0x469   :  { %v804_v16 = vpack.c.bf16 %v779_v15, %v777_v57  ;;  %v791_v34 = vsel %vm93_vm3, %v789_v30, %v790_v56  ;;  %v793_v17 = vsel %vm93_vm3, %v790_v56, %v792_v31  ;;  %v781_v42 = vrot.slane %v760_v38, 1 }
 0x46a   :  { %v805_v18 = vpack.c.bf16 %v793_v17, %v791_v34  ;;  %v783_v43 = vrot.slane %v770_v40, 1  ;;  %v794_v44 = vrot.slane %v768_v39, 2  ;;  %v795_v35 = vrot.slane %v760_v38, 2 }
 0x46b   :  { %1028 = vmatmul.bf16.vlgmr.msra.gmra.mxu1 %v804_v16  ;;  %v797_v45 = vrot.slane %v770_v40, 2  ;;  %v1392_v60 = vpack.c.bf16 %v760_v38, %v758_v58  ;;  %v782_v59 = vsel %vm70_vm1, %v780_v41, %v781_v42 }
 0x46c   :  { %1047 = vmatmul.bf16.vlgmr.msra.gmra.mxu2 %v805_v18  ;;  %v784_v62 = vsel %vm70_vm1, %v781_v42, %v783_v43  ;;  %v796_v61 = vsel %vm93_vm3, %v794_v44, %v795_v35 }
 0x46d   :  { %v798_v63 = vsel %vm93_vm3, %v795_v35, %v797_v45  ;;  %v807_v0 = vpack.c.bf16 %v784_v62, %v782_v59 }
 0x46e   :  { %v808_v1 = vpack.c.bf16 %v798_v63, %v796_v61 }
 0x478   :  { %1393 = vmatmul.msk.bf16.gmra.mxu0 %vm1881_vm0, %v1392_v60 }
 0x47b   :  { %1033 = vmatmul.bf16.gmra.mxu1 %v807_v0  ;;  %v1147_v0 = vperm.slane %v1864_v20, 5 }
 0x47c   :  { %1052 = vmatmul.bf16.gmra.mxu2 %v808_v1 }
 0x4e5   :  { %v1010_v2 = vpop.f32.mrf.mxu0 }
 0x4e8   :  { %v1029_v3 = vpop.f32.mrf.mxu1 }
 0x4e9   :  { %v1030_v32 = vadd.f32 %v1029_v3, %v1010_v2 }
 0x4ed   :  { %v1012_v6 = vpop.f32.mrf.mxu0 }
 0x4ef   :  { %v1048_v4 = vpop.f32.mrf.mxu2 }
 0x4f0   :  { %v1031_v5 = vpop.f32.mrf.mxu1  ;;  %v1049_v36 = vadd.f32 %v1048_v4, %v1030_v32 }
 0x4f1   :  { %v1032_v22 = vadd.f32 %v1031_v5, %v1012_v6 }
 0x4f5   :  { %v1015_v19 = vpop.f32.mrf.mxu0 }
 0x4f7   :  { %v1050_v13 = vpop.f32.mrf.mxu2 }
 0x4f8   :  { %v1034_v14 = vpop.f32.mrf.mxu1  ;;  %v1051_v46 = vadd.f32 %v1050_v13, %v1032_v22 }
 0x4f9   :  { %v1035_v47 = vadd.f32 %v1034_v14, %v1015_v19 }
 0x4fa   :  { %v1058_v24 = vadd.f32 %v1051_v46, %v1049_v36 }
 0x4fd   :  { %v1017_v49 = vpop.f32.mrf.mxu0 }
 0x4ff   :  { %v1053_v21 = vpop.f32.mrf.mxu2 }
 0x500   :  { %v1036_v23 = vpop.f32.mrf.mxu1  ;;  %v1054_v48 = vadd.f32 %v1053_v21, %v1035_v47 }
 0x501   :  { %v1037_v50 = vadd.f32 %v1036_v23, %v1017_v49 }
 0x502   :  { %v1059_v51 = vadd.f32 %v1058_v24, %v1054_v48 }
 0x507   :  { %v1055_v25 = vpop.f32.mrf.mxu2 }
 0x508   :  { %v1056_v52 = vadd.f32 %v1055_v25, %v1037_v50 }
 0x50a   :  { %v1060_v26 = vadd.f32 %v1059_v51, %v1056_v52 }
 0x50c   :  { %v1061_v8 = vrot.slane %v1060_v26, 4 }
 0x50e   :  { %v1062_v53 = vadd.f32 %v1061_v8, %v1060_v26 }
 0x510   :  { %v1063_v27 = vrot.slane %v1062_v53, 2 }
 0x512   :  { %v1064_v10 = vadd.f32 %v1063_v27, %v1062_v53 }
 0x514   :  { %v1065_v7 = vrot.slane %v1064_v10, 1 }
 0x516   :  { %v1066_v54 = vadd.f32 %v1065_v7, %v1064_v10 }
 0x518   :  { %1083 = vmatmul.f32.vlgmr.msra.gmra.mxu3 %v1066_v54 }
 0x59b   :  { %v1084_v11 = vpop.f32.mrf.mxu3 }
 0x59c   :  { %v1087_v28 = vmul.f32 0.001953125, %v1084_v11 }
 0x59e   :  { %v1088_v12 = vperm.slane %v1087_v28, 0 }
 0x5a0   :  { %v1089_v9 = vsub.f32 %v1049_v36, %v1088_v12  ;;  %v1090_v55 = vsub.f32 %v1051_v46, %v1088_v12  ;;  %v1091_v29 = vsub.f32 %v1054_v48, %v1088_v12  ;;  %v1092_v30 = vsub.f32 %v1056_v52, %v1088_v12 }
 0x5a2   :  { %v1093_v56 = vmul.f32 %v1089_v9, %v1089_v9  ;;  %v1094_v31 = vmul.f32 %v1090_v55, %v1090_v55  ;;  %v1095_v33 = vmul.f32 %v1091_v29, %v1091_v29  ;;  %v1096_v15 = vmul.f32 %v1092_v30, %v1092_v30 }
 0x5a4   :  { %v1097_v57 = vadd.f32 %v1094_v31, %v1093_v56 }
 0x5a6   :  { %v1098_v16 = vadd.f32 %v1097_v57, %v1095_v33 }
 0x5a8   :  { %v1099_v34 = vadd.f32 %v1098_v16, %v1096_v15 }
 0x5aa   :  { %v1100_v17 = vrot.slane %v1099_v34, 4 }
 0x5ac   :  { %v1101_v18 = vadd.f32 %v1100_v17, %v1099_v34 }
 0x5ae   :  { %v1102_v58 = vrot.slane %v1101_v18, 2 }
 0x5b0   :  { %v1103_v37 = vadd.f32 %v1102_v58, %v1101_v18 }
 0x5b2   :  { %v1104_v38 = vrot.slane %v1103_v37, 1 }
 0x5b4   :  { %v1105_v39 = vadd.f32 %v1104_v38, %v1103_v37 }
 0x5b6   :  { %1122 = vmatmul.f32.vlgmr.msrb.gmra.mxu0 %v1105_v39 }
 0x633   :  { %v1123_v40 = vpop.f32.mrf.mxu0 }
 0x634   :  { %v1126_v41 = vmul.f32 0.001953125, %v1123_v40 }
 0x636   :  { %v1127_v42 = vadd.f32 1e-05, %v1126_v41 }
 0x638   :  { %1496 = vrsqrt.f32 %v1127_v42  ;;  %vm1134_vm3 = vweird.f32 %v1127_v42 }
 0x63e   :  { %v1497_v43 = vpop.eup %1496 }
 0x63f   :  { %v1129_v44 = vmul.f32 %v1497_v43, %v1127_v42  ;;  %vm1135_vm1 = vweird.f32 %v1497_v43 }
 0x640   :  { %vm1136_vm6 = vmor %vm1134_vm3, %vm1135_vm1 }
 0x641   :  { %v1130_v35 = vmul.f32 %v1497_v43, %v1129_v44 }
 0x643   :  { %v1131_v45 = vmul.f32 0.5, %v1130_v35 }
 0x645   :  { %v1132_v60 = vsub.f32 1.5, %v1131_v45 }
 0x647   :  { %v1133_v59 = vmul.f32 %v1497_v43, %v1132_v60 }
 0x649   :  { %v1137_v62 = vsel %vm1136_vm6, %v1497_v43, %v1133_v59 }
 0x64a   :  { %v1139_v61 = vrot.slane %v1137_v62, 4 }
 0x64c   :  { %v1141_v63 = vmul.f32 %v1139_v61, %v1864_v20 }
 0x64e   :  { %v1142_v1 = vperm.slane %v1141_v63, 4 }
 0x650   :  { %v1143_v2 = vmul.f32 %v1142_v1, %v1089_v9  ;;  %v1144_v3 = vmul.f32 %v1142_v1, %v1090_v55  ;;  %v1145_v4 = vmul.f32 %v1142_v1, %v1091_v29  ;;  %v1146_v5 = vmul.f32 %v1142_v1, %v1092_v30 }
 0x652   :  { %v1148_v6 = vadd.f32 %v1147_v0, %v1143_v2  ;;  %v1149_v13 = vadd.f32 %v1147_v0, %v1144_v3  ;;  %v1150_v14 = vadd.f32 %v1147_v0, %v1145_v4  ;;  %v1151_v19 = vadd.f32 %v1147_v0, %v1146_v5 }
 0x654   :  { %v1152_v21 = vmax.f32 %v1148_v6, 0.0  ;;  %v1153_v22 = vmax.f32 %v1149_v13, 0.0  ;;  %v1154_v32 = vmax.f32 %v1150_v14, 0.0  ;;  %v1155_v46 = vmax.f32 %v1151_v19, 0.0 }
 0x656   :  { %1156 = vst [vmem:[%s2067_s6] sm:$0xff] %v1152_v21 }
 0x657   :  { %1157 = vst [vmem:[%s2067_s6 + $0x8] sm:$0xff] %v1153_v22 }
 0x658   :  { %1158 = vst [vmem:[%s2067_s6 + $0x10] sm:$0xff] %v1154_v32 }
 0x659   :  { %1159 = vst [vmem:[%s2067_s6 + $0x18] sm:$0xff] %v1155_v46 }

</bundles_post_ra>
